<compile_context>
chip_gen: v6e
topology: v6e:2x2x1
jax: 0.10.0
libtpu: 0.0.40
codegen_flags: <defaults>
</compile_context>

<pallas_src>
import functools

import jax
import jax.numpy as jnp
from jax.experimental import pallas as pl
from jax.experimental.pallas import tpu as pltpu

_LANE = 128
_SMALL_INPUT_BYPASS = 128 * 1024          # elements; below this use plain JAX


def _cdiv(a, b):
    return -(-a // b)


def _round_up(a, b):
    return _cdiv(a, b) * b


@functools.lru_cache(maxsize=1)
def _tpu_caps():
    """Returns (vmem_capacity_bytes, tensorcores_per_device), defensively."""
    vmem = None
    cores = None
    info = None
    try:
        info = pltpu.get_tpu_info()
    except Exception:
        info = None
    if info is not None:
        try:
            v = getattr(info, "vmem_capacity_bytes", None)
            vmem = int(v) if v else None
        except Exception:
            vmem = None
        for name in ("num_tensorcores", "tensorcores_per_chip", "num_cores",
                     "core_count", "cores_per_chip"):
            try:
                v = getattr(info, name, None)
                if v:
                    cores = int(v)
                    break
            except Exception:
                pass
    kind = ""
    try:
        kind = jax.devices()[0].device_kind.lower()
    except Exception:
        pass
    if vmem is None:
        vmem = (64 << 20) if "v7" in kind else (128 << 20)
    if cores is None:
        cores = 2 if ("v7" in kind or "v4" in kind or "v5p" in kind) else 1
    return vmem, cores


def _mse_partial_kernel(a_ref, b_ref, out_ref, *, total_rows, last_block, ragged):
    """Accumulate per-split partial sums of squared differences.

    Grid: (split, inner_blocks).  The (1, 8, 128) output block is indexed only
    by the parallel axis, so it stays resident across the inner reduction axis
    and acts as a vreg-shaped accumulator.
    """
    c = pl.program_id(0)
    i = pl.program_id(1)

    @pl.when(i == 0)
    def _():
        out_ref[...] = jnp.zeros_like(out_ref)

    tile_m = a_ref.shape[0]
    a = a_ref[...].astype(jnp.float32)
    b = b_ref[...].astype(jnp.float32)
    d = a - b
    sq = d * d

    def _fold(x):
        # (tile_m, 128) -> (1, 8, 128): pure VPU adds (no cross-lane reduce in
        # the hot loop).  tile_m is always a multiple of 8.
        return x.reshape(tile_m // 8, 8, _LANE).sum(axis=0)[None]

    if not ragged:
        out_ref[...] += _fold(sq)
    else:
        # Only the last global block contains rows past total_rows; interior
        # blocks take the mask-free fast path (no iota/cmp/select per vreg).
        g = c * pl.num_programs(1) + i

        @pl.when(g != last_block)
        def _():
            out_ref[...] += _fold(sq)

        @pl.when(g == last_block)
        def _():
            row = g * tile_m + jax.lax.broadcasted_iota(jnp.int32, sq.shape, 0)
            # `where` selects 0.0 in the padded region, so unspecified
            # (possibly NaN/Inf) padding never contributes.
            out_ref[...] += _fold(jnp.where(row < total_rows, sq, 0.0))


def feature_loss(features_real, features_fake, *, target_block_bytes=4 << 20):
    """Mean squared error between two equally shaped arrays (f32 scalar)."""
    if features_real.shape != features_fake.shape:
        raise ValueError("feature maps must have identical shapes")
    n = int(features_real.size)
    if n == 0:
        return jnp.float32(0.0)

    a = features_real.reshape(-1)
    b = features_fake.reshape(-1)
    inv_n = 1.0 / float(n)   # avoid rounding n itself to f32 for huge inputs

    itemsize = int(jnp.dtype(features_real.dtype).itemsize)
    pack = max(8, 32 // max(itemsize, 1))        # sublane packing of input dtype
    total_rows = n // _LANE
    bulk_n = total_rows * _LANE

    # Small-input bypass: XLA fuses sub/square/reduce fine at these sizes and
    # the fixed pallas_call + per-grid-step overhead would dominate.
    if n < _SMALL_INPUT_BYPASS or total_rows < pack:
        d = a.astype(jnp.float32) - b.astype(jnp.float32)
        return jnp.sum(d * d) * jnp.float32(inv_n)

    vmem_cap, n_cores = _tpu_caps()

    # ---- tiling: ~4 MiB per input block regardless of dtype -----------------
    tm_target = max(pack, (target_block_bytes // (_LANE * itemsize)) // pack * pack)
    split = n_cores if (n_cores > 1 and total_rows >= n_cores * pack) else 1
    tm_cap = max(pack, min(tm_target, (total_rows // pack) * pack))
    # Pick tm so num_blocks is an exact multiple of `split`; the index_map is
    # then trivially in range (no clamping needed).
    target_blocks = _round_up(_cdiv(total_rows, tm_cap), split)
    tm = min(tm_cap, _round_up(_cdiv(total_rows, target_blocks), pack))
    num_blocks = _cdiv(total_rows, tm)
    if num_blocks % split:               # rare fallback: drop the core split
        split = 1
    inner_blocks = num_blocks // split

    a2 = a[:bulk_n].reshape(total_rows, _LANE)   # no-op when n % 128 == 0
    b2 = b[:bulk_n].reshape(total_rows, _LANE)

    def in_map(c, i, _ib=inner_blocks):
        return (c * _ib + i, 0)

    # 2 inputs x 2 pipeline buffers per block + output + headroom; stays well
    # under per-core VMEM (64 MiB on v7x, 128 MiB on v5e/v6e).
    block_bytes = tm * _LANE * itemsize
    cap = (64 << 20) if vmem_cap >= (128 << 20) else (48 << 20)
    vmem_limit = int(min(max(4 * block_bytes + (4 << 20), 16 << 20), cap))

    kernel = functools.partial(
        _mse_partial_kernel,
        total_rows=total_rows,
        last_block=num_blocks - 1,
        ragged=(total_rows % tm != 0),
    )

    # TODO(synk): on v7x, confirm in a trace that the leading "parallel" axis
    # actually shards across both TensorCores; if not, switch it to
    # pltpu.CORE_PARALLEL (keeping split == core count).
    partial = pl.pallas_call(
        kernel,
        out_shape=jax.ShapeDtypeStruct((split, 8, _LANE), jnp.float32),
        grid_spec=pltpu.PrefetchScalarGridSpec(
            num_scalar_prefetch=0,
            grid=(split, inner_blocks),
            in_specs=[
                pl.BlockSpec((tm, _LANE), in_map),
                pl.BlockSpec((tm, _LANE), in_map),
            ],
            out_specs=pl.BlockSpec((1, 8, _LANE), lambda c, i: (c, 0, 0)),
        ),
        compiler_params=pltpu.CompilerParams(
            dimension_semantics=("parallel", "arbitrary"),
            vmem_limit_bytes=vmem_limit,
        ),
    )(a2, b2)

    # Single cross-lane reduce, once, outside the hot loop.
    ssd = jnp.sum(partial)

    tail_n = n - bulk_n
    if tail_n:
        # Last n % 128 elements: plain JAX (tiny).
        ta = a[bulk_n:].astype(jnp.float32)
        tb = b[bulk_n:].astype(jnp.float32)
        ssd = ssd + jnp.sum((ta - tb) ** 2)

    return ssd * jnp.float32(inv_n)


def _reference(x, y):
    return jnp.mean((x.astype(jnp.float32) - y.astype(jnp.float32)) ** 2)


def _check(shape, dtype, key):
    k1, k2 = jax.random.split(key)
    x = jax.random.normal(k1, shape, dtype=jnp.float32).astype(dtype)
    y = jax.random.normal(k2, shape, dtype=jnp.float32).astype(dtype)
    got = jax.block_until_ready(feature_loss(x, y))
    want = jax.block_until_ready(_reference(x, y))
    assert jnp.allclose(got, want, rtol=1e-4, atol=1e-6), (shape, dtype, got, want)


if __name__ == "__main__":
    key = jax.random.PRNGKey(0)
    keys = jax.random.split(key, 4)

    # Canonical small NCHW feature map (module's expected use) -> JAX bypass.
    _check((2, 4, 16, 16), jnp.float32, keys[0])
    # Larger map -> Pallas kernel path (1 MiB per input, f32).
    _check((2, 8, 128, 128), jnp.float32, keys[1])
    # bf16 inputs -> native-dtype DMA with in-kernel f32 cast.
    _check((2, 8, 128, 128), jnp.bfloat16, keys[2])
    # Ragged total size -> in-kernel gated row mask + plain-JAX 128-tail.
    _check((2, 3, 70, 330), jnp.float32, keys[3])

    print("KERNEL_OK")
</pallas_src>

<mosaic_0001>
module attributes {stable_mosaic.version = 11 : i64} {
  func.func @_mse_partial_kernel(%arg0: i32, %arg1: i32, %arg2: memref<2048x128xf32, #tpu.memory_space<vmem>>, %arg3: memref<2048x128xf32, #tpu.memory_space<vmem>>, %arg4: memref<1x8x128xf32, #tpu.memory_space<vmem>>) attributes {dimension_semantics = [#tpu.dimension_semantics<parallel>, #tpu.dimension_semantics<arbitrary>], iteration_bounds = array<i64: 1, 1>, scalar_prefetch = 0 : i64, scratch_operands = 0 : i64, tpu.core_type = #tpu.core_type<tc>, window_params = [{transform_indices = @transform_0, window_bounds = array<i64: 2048, 128>}, {transform_indices = @transform_1, window_bounds = array<i64: 2048, 128>}, {transform_indices = @transform_2, window_bounds = array<i64: 1, 8, 128>}]} {
    %c0_i32 = arith.constant 0 : i32
    %0 = arith.cmpi eq, %arg1, %c0_i32 : i32
    %1 = arith.extui %0 : i1 to i32
    %c0_i32_0 = arith.constant 0 : i32
    %2 = arith.cmpi ne, %1, %c0_i32_0 : i32
    scf.if %2 {
      %cst_10 = arith.constant 0.000000e+00 : f32
      %13 = vector.broadcast %cst_10 : f32 to vector<1x8x128xf32>
      %c0_11 = arith.constant 0 : index
      %c0_12 = arith.constant 0 : index
      %c0_13 = arith.constant 0 : index
      %14 = vector.load %arg4[%c0_11, %c0_12, %c0_13] : memref<1x8x128xf32, #tpu.memory_space<vmem>>, vector<1x8x128xf32>
      tpu.vector_store %arg4[%c0_11, %c0_12, %c0_13], %13 {strides = array<i32>} : memref<1x8x128xf32, #tpu.memory_space<vmem>>, vector<1x8x128xf32>,
    } else {
    }
    %c0 = arith.constant 0 : index
    %c0_1 = arith.constant 0 : index
    %3 = vector.load %arg2[%c0, %c0_1] : memref<2048x128xf32, #tpu.memory_space<vmem>>, vector<2048x128xf32>
    %c0_2 = arith.constant 0 : index
    %c0_3 = arith.constant 0 : index
    %4 = vector.load %arg3[%c0_2, %c0_3] : memref<2048x128xf32, #tpu.memory_space<vmem>>, vector<2048x128xf32>
    %5 = arith.subf %3, %4 : vector<2048x128xf32>
    %6 = arith.mulf %5, %5 : vector<2048x128xf32>
    %c0_4 = arith.constant 0 : index
    %c0_5 = arith.constant 0 : index
    %c0_6 = arith.constant 0 : index
    %7 = vector.load %arg4[%c0_4, %c0_5, %c0_6] : memref<1x8x128xf32, #tpu.memory_space<vmem>>, vector<1x8x128xf32>
    %8 = vector.shape_cast %6 : vector<2048x128xf32> to vector<256x8x128xf32>
    %cst = arith.constant dense<0.000000e+00> : vector<8x128xf32>
    %9 = vector.multi_reduction <add>, %8, %cst [0] : vector<256x8x128xf32> to vector<8x128xf32>
    %10 = vector.shape_cast %9 : vector<8x128xf32> to vector<1x8x128xf32>
    %11 = arith.addf %7, %10 : vector<1x8x128xf32>
    %c0_7 = arith.constant 0 : index
    %c0_8 = arith.constant 0 : index
    %c0_9 = arith.constant 0 : index
    %12 = vector.load %arg4[%c0_7, %c0_8, %c0_9] : memref<1x8x128xf32, #tpu.memory_space<vmem>>, vector<1x8x128xf32>
    tpu.vector_store %arg4[%c0_7, %c0_8, %c0_9], %11 {strides = array<i32>} : memref<1x8x128xf32, #tpu.memory_space<vmem>>, vector<1x8x128xf32>,
    return
  }
  func.func @transform_0(%arg0: i32, %arg1: i32) -> (i32, i32) {
    %c1_i32 = arith.constant 1 : i32
    %0 = arith.muli %arg0, %c1_i32 : i32
    %1 = arith.addi %0, %arg1 : i32
    %c0_i32 = arith.constant 0 : i32
    %c0_i32_0 = arith.constant 0 : i32
    return %1, %c0_i32 : i32, i32
  }
  func.func @transform_1(%arg0: i32, %arg1: i32) -> (i32, i32) {
    %c1_i32 = arith.constant 1 : i32
    %0 = arith.muli %arg0, %c1_i32 : i32
    %1 = arith.addi %0, %arg1 : i32
    %c0_i32 = arith.constant 0 : i32
    %c0_i32_0 = arith.constant 0 : i32
    return %1, %c0_i32 : i32, i32
  }
  func.func @transform_2(%arg0: i32, %arg1: i32) -> (i32, i32, i32) {
    %c0_i32 = arith.constant 0 : i32
    %c0_i32_0 = arith.constant 0 : i32
    %c0_i32_1 = arith.constant 0 : i32
    return %arg0, %c0_i32, %c0_i32_0 : i32, i32, i32
  }
}

</mosaic_0001>

<bundles_post_ra>
// kernel: tpu_custom_call.1
= control target key start
LH: loop header
LB: loop body
LE: loop exit
PB: predicated region body
PF: predicated region fallthrough
CT: control target
= control target key end

     0   :  { %7 = vsyncpa [#allocation3], 0  ;;  %s1456_s0 = inlined_call_operand.hbm [shape: f32[2048,128], index: 0, kind: input, shape index: {}]   ;;  %s1457_s1 = inlined_call_operand.hbm [shape: f32[2048,128], index: 1, kind: input, shape index: {}]   ;;  %s1458_s2 = inlined_call_operand.hbm [shape: f32[1,8,128], index: 2, kind: output, shape index: {}]  }
   0x1   :  { %8 = vsyncpa [#allocation6], 0 }
   0x2   :  { %9 = vsyncpa [#allocation4], 0  ;;  %s1427_s9 = smov [#allocation2]  }
   0x3   :  { %s19_s10 = sshll.u32 %s1427_s9, 4  ;;  %s20_s10 = int_to_ptr.vmem [resolvable:$true] %s19_s10 }
   0x4   :  { %s1369_s11 = scalar_lea.vmem %s20_s10, 32768  ;;  %p1374_p1 = scmp.lt.s32.totalorder %s20_s10, %s20_s10 }
   0x5   :  { %p1370_p0 = scmp.ne.s32.totalorder %s20_s10, %s1369_s11  ;;  %p1375_p2 = scmp.lt.s32.totalorder %s1369_s11, %s1369_s11 }
   0x7   :  { %p1376_p3 = por %p1375_p2, %p1374_p1 }
   0x9   :  { %p1377_p4 = pnand %p1376_p3, %p1370_p0 }
   0xb   :  { %1380 = shalt.err (!%p1377_p4)
}
   0xc   :  { %s1428_s12 = smov 128   ;;  %s1429_s13 = smov 8  }
   0xd   :  { %25 = dma.hbm_to_vmem [thread:$0]  %s1456_s0, 32768, %s20_s10, [#allocation3], %s1428_s12, %s1428_s12, %s1429_s13  }
   0xe   :  { %s1430_s16 = smov [#allocation5]  }
   0xf   :  { %s35_s17 = sshll.u32 %s1430_s16, 4  ;;  %s36_s17 = int_to_ptr.vmem [resolvable:$true] %s35_s17 }
  0x10   :  { %s1389_s18 = scalar_lea.vmem %s36_s17, 32768  ;;  %p1394_p6 = scmp.lt.s32.totalorder %s36_s17, %s36_s17 }
  0x11   :  { %p1390_p5 = scmp.ne.s32.totalorder %s36_s17, %s1389_s18  ;;  %p1395_p7 = scmp.lt.s32.totalorder %s1389_s18, %s1389_s18 }
  0x13   :  { %p1396_p8 = por %p1395_p7, %p1394_p6 }
  0x15   :  { %p1397_p9 = pnand %p1396_p8, %p1390_p5 }
  0x17   :  { %1400 = shalt.err (!%p1397_p9)
}
  0x18   :  { %41 = dma.hbm_to_vmem [thread:$0]  %s1457_s1, 32768, %s36_s17, [#allocation6], %s1428_s12, %s1428_s12, %s1429_s13  }
  0x19   :  { %1421 = dma.done.wait [#allocation3], 32768  }
  0x1a   :  { %1422 = vsyncadd [#allocation3], 4294934528 }
  0x1b   :  { %1423 = dma.done.wait [#allocation6], 32768  }
  0x1c   :  { %1424 = vsyncadd [#allocation6], 4294934528  ;;  %v57_v0 = vld [vmem:[#allocation2] sm:$0xff]  ;;  %v58_v1 = vld [vmem:[#allocation2 + $0x8] sm:$0xff]  ;;  %s1431_s0 = smov [#allocation7]  }
  0x1d   :  { %v313_v2 = vld [vmem:[#allocation5] sm:$0xff]  ;;  %v314_v3 = vld [vmem:[#allocation5 + $0x8] sm:$0xff]  ;;  %v59_v4 = vld [vmem:[#allocation2 + $0x10] sm:$0xff]  ;;  %s1345_s1 = sshll.u32 %s1431_s0, 4  ;;  %s1346_s1 = int_to_ptr.vmem [resolvable:$true] %s1345_s1 }
  0x1e   :  { %v315_v5 = vld [vmem:[#allocation5 + $0x10] sm:$0xff]  ;;  %v569_v6 = vsub.f32 %v57_v0, %v313_v2  ;;  %v570_v7 = vsub.f32 %v58_v1, %v314_v3  ;;  %v60_v8 = vld [vmem:[#allocation2 + $0x18] sm:$0xff]  ;;  %v61_v11 = vld [vmem:[#allocation2 + $0x20] sm:$0xff]  ;;  %s1401_s21 = scalar_lea.vmem %s1346_s1, 128  ;;  %p1406_p11 = scmp.lt.s32.totalorder %s1346_s1, %s1346_s1 }
  0x1f   :  { %v316_v9 = vld [vmem:[#allocation5 + $0x18] sm:$0xff]  ;;  %v571_v10 = vsub.f32 %v59_v4, %v315_v5  ;;  %v317_v12 = vld [vmem:[#allocation5 + $0x20] sm:$0xff]  ;;  %v62_v16 = vld [vmem:[#allocation2 + $0x28] sm:$0xff]  ;;  %p1402_p10 = scmp.ne.s32.totalorder %s1346_s1, %s1401_s21  ;;  %p1407_p12 = scmp.lt.s32.totalorder %s1401_s21, %s1401_s21 }
  0x20   :  { %v572_v13 = vsub.f32 %v60_v8, %v316_v9  ;;  %v825_v14 = vmul.f32 %v569_v6, %v569_v6  ;;  %v826_v15 = vmul.f32 %v570_v7, %v570_v7  ;;  %v318_v17 = vld [vmem:[#allocation5 + $0x28] sm:$0xff]  ;;  %v573_v18 = vsub.f32 %v61_v11, %v317_v12  ;;  %v63_v20 = vld [vmem:[#allocation2 + $0x30] sm:$0xff]  ;;  %v64_v25 = vld [vmem:[#allocation2 + $0x38] sm:$0xff] }
  0x21   :  { %v827_v19 = vmul.f32 %v571_v10, %v571_v10  ;;  %v319_v21 = vld [vmem:[#allocation5 + $0x30] sm:$0xff]  ;;  %v574_v22 = vsub.f32 %v62_v16, %v318_v17  ;;  %v320_v26 = vld [vmem:[#allocation5 + $0x38] sm:$0xff]  ;;  %v65_v30 = vld [vmem:[#allocation2 + $0x40] sm:$0xff]  ;;  %p1408_p13 = por %p1407_p12, %p1406_p11 }
  0x22   :  { %v828_v23 = vmul.f32 %v572_v13, %v572_v13  ;;  %v1082_v24 = vadd.f32 %v826_v15, %v825_v14  ;;  %v575_v27 = vsub.f32 %v63_v20, %v319_v21  ;;  %v829_v28 = vmul.f32 %v573_v18, %v573_v18  ;;  %v321_v31 = vld [vmem:[#allocation5 + $0x40] sm:$0xff]  ;;  %v66_v35 = vld [vmem:[#allocation2 + $0x48] sm:$0xff]  ;;  %v67_v40 = vld [vmem:[#allocation2 + $0x50] sm:$0xff] }
  0x23   :  { %v576_v32 = vsub.f32 %v64_v25, %v320_v26  ;;  %v830_v33 = vmul.f32 %v574_v22, %v574_v22  ;;  %v322_v36 = vld [vmem:[#allocation5 + $0x48] sm:$0xff]  ;;  %v577_v37 = vsub.f32 %v65_v30, %v321_v31  ;;  %v323_v41 = vld [vmem:[#allocation5 + $0x50] sm:$0xff]  ;;  %v68_v45 = vld [vmem:[#allocation2 + $0x58] sm:$0xff]  ;;  %p1409_p0 = pnand %p1408_p13, %p1402_p10 }
  0x24   :  { %v1083_v29 = vadd.f32 %v1082_v24, %v827_v19  ;;  %v831_v38 = vmul.f32 %v575_v27, %v575_v27  ;;  %v578_v42 = vsub.f32 %v66_v35, %v322_v36  ;;  %v324_v46 = vld [vmem:[#allocation5 + $0x58] sm:$0xff]  ;;  %v579_v47 = vsub.f32 %v67_v40, %v323_v41  ;;  %v69_v50 = vld [vmem:[#allocation2 + $0x60] sm:$0xff]  ;;  %v70_v55 = vld [vmem:[#allocation2 + $0x68] sm:$0xff] }
  0x25   :  { %v832_v43 = vmul.f32 %v576_v32, %v576_v32  ;;  %v833_v48 = vmul.f32 %v577_v37, %v577_v37  ;;  %v325_v51 = vld [vmem:[#allocation5 + $0x60] sm:$0xff]  ;;  %v580_v52 = vsub.f32 %v68_v45, %v324_v46  ;;  %v326_v56 = vld [vmem:[#allocation5 + $0x68] sm:$0xff]  ;;  %v71_v60 = vld [vmem:[#allocation2 + $0x70] sm:$0xff] }
  0x26   :  { %v1084_v34 = vadd.f32 %v1083_v29, %v828_v23  ;;  %v834_v53 = vmul.f32 %v578_v42, %v578_v42  ;;  %v581_v57 = vsub.f32 %v69_v50, %v325_v51  ;;  %v835_v58 = vmul.f32 %v579_v47, %v579_v47  ;;  %v327_v61 = vld [vmem:[#allocation5 + $0x70] sm:$0xff]  ;;  %v72_v1 = vld [vmem:[#allocation2 + $0x78] sm:$0xff]  ;;  %v73_v6 = vld [vmem:[#allocation2 + $0x80] sm:$0xff] }
  0x27   :  { %v582_v62 = vsub.f32 %v70_v55, %v326_v56  ;;  %v836_v63 = vmul.f32 %v580_v52, %v580_v52  ;;  %v328_v2 = vld [vmem:[#allocation5 + $0x78] sm:$0xff]  ;;  %v583_v3 = vsub.f32 %v71_v60, %v327_v61  ;;  %v329_v7 = vld [vmem:[#allocation5 + $0x80] sm:$0xff]  ;;  %v74_v11 = vld [vmem:[#allocation2 + $0x88] sm:$0xff] }
  0x28   :  { %v1085_v39 = vadd.f32 %v1084_v34, %v829_v28  ;;  %v837_v4 = vmul.f32 %v581_v57, %v581_v57  ;;  %v584_v8 = vsub.f32 %v72_v1, %v328_v2  ;;  %v330_v12 = vld [vmem:[#allocation5 + $0x88] sm:$0xff]  ;;  %v585_v13 = vsub.f32 %v73_v6, %v329_v7  ;;  %v75_v16 = vld [vmem:[#allocation2 + $0x90] sm:$0xff]  ;;  %v76_v21 = vld [vmem:[#allocation2 + $0x98] sm:$0xff] }
  0x29   :  { %v838_v9 = vmul.f32 %v582_v62, %v582_v62  ;;  %v839_v14 = vmul.f32 %v583_v3, %v583_v3  ;;  %v331_v17 = vld [vmem:[#allocation5 + $0x90] sm:$0xff]  ;;  %v586_v18 = vsub.f32 %v74_v11, %v330_v12  ;;  %v332_v22 = vld [vmem:[#allocation5 + $0x98] sm:$0xff]  ;;  %v77_v26 = vld [vmem:[#allocation2 + $0xa0] sm:$0xff] }
  0x2a   :  { %v1086_v44 = vadd.f32 %v1085_v39, %v830_v33  ;;  %v840_v19 = vmul.f32 %v584_v8, %v584_v8  ;;  %v587_v23 = vsub.f32 %v75_v16, %v331_v17  ;;  %v841_v24 = vmul.f32 %v585_v13, %v585_v13  ;;  %v333_v27 = vld [vmem:[#allocation5 + $0xa0] sm:$0xff]  ;;  %v78_v31 = vld [vmem:[#allocation2 + $0xa8] sm:$0xff]  ;;  %v79_v36 = vld [vmem:[#allocation2 + $0xb0] sm:$0xff] }
  0x2b   :  { %v588_v28 = vsub.f32 %v76_v21, %v332_v22  ;;  %v842_v29 = vmul.f32 %v586_v18, %v586_v18  ;;  %v334_v32 = vld [vmem:[#allocation5 + $0xa8] sm:$0xff]  ;;  %v589_v33 = vsub.f32 %v77_v26, %v333_v27  ;;  %v335_v37 = vld [vmem:[#allocation5 + $0xb0] sm:$0xff]  ;;  %v80_v41 = vld [vmem:[#allocation2 + $0xb8] sm:$0xff] }
  0x2c   :  { %v1087_v49 = vadd.f32 %v1086_v44, %v831_v38  ;;  %v843_v34 = vmul.f32 %v587_v23, %v587_v23  ;;  %v590_v38 = vsub.f32 %v78_v31, %v334_v32  ;;  %v336_v42 = vld [vmem:[#allocation5 + $0xb8] sm:$0xff]  ;;  %v81_v46 = vld [vmem:[#allocation2 + $0xc0] sm:$0xff]  ;;  %v82_v51 = vld [vmem:[#allocation2 + $0xc8] sm:$0xff] }
  0x2d   :  { %v844_v39 = vmul.f32 %v588_v28, %v588_v28  ;;  %v845_v44 = vmul.f32 %v589_v33, %v589_v33  ;;  %v337_v47 = vld [vmem:[#allocation5 + $0xc0] sm:$0xff]  ;;  %v338_v52 = vld [vmem:[#allocation5 + $0xc8] sm:$0xff]  ;;  %v83_v56 = vld [vmem:[#allocation2 + $0xd0] sm:$0xff] }
  0x2e   :  { %v1088_v54 = vadd.f32 %v1087_v49, %v832_v43  ;;  %v591_v43 = vsub.f32 %v79_v36, %v335_v37  ;;  %v846_v49 = vmul.f32 %v590_v38, %v590_v38  ;;  %v339_v57 = vld [vmem:[#allocation5 + $0xd0] sm:$0xff]  ;;  %v84_v61 = vld [vmem:[#allocation2 + $0xd8] sm:$0xff]  ;;  %v85_v2 = vld [vmem:[#allocation2 + $0xe0] sm:$0xff] }
  0x2f   :  { %v340_v62 = vld [vmem:[#allocation5 + $0xd8] sm:$0xff]  ;;  %v341_v3 = vld [vmem:[#allocation5 + $0xe0] sm:$0xff]  ;;  %v86_v7 = vld [vmem:[#allocation2 + $0xe8] sm:$0xff] }
  0x30   :  { %v1089_v59 = vadd.f32 %v1088_v54, %v833_v48  ;;  %v592_v48 = vsub.f32 %v80_v41, %v336_v42  ;;  %v847_v54 = vmul.f32 %v591_v43, %v591_v43  ;;  %v342_v8 = vld [vmem:[#allocation5 + $0xe8] sm:$0xff]  ;;  %v87_v12 = vld [vmem:[#allocation2 + $0xf0] sm:$0xff]  ;;  %v88_v17 = vld [vmem:[#allocation2 + $0xf8] sm:$0xff] }
  0x31   :  { %v343_v13 = vld [vmem:[#allocation5 + $0xf0] sm:$0xff]  ;;  %v344_v18 = vld [vmem:[#allocation5 + $0xf8] sm:$0xff]  ;;  %v89_v22 = vld [vmem:[#allocation2 + $0x100] sm:$0xff] }
  0x32   :  { %v1090_v0 = vadd.f32 %v1089_v59, %v834_v53  ;;  %v593_v53 = vsub.f32 %v81_v46, %v337_v47  ;;  %v848_v59 = vmul.f32 %v592_v48, %v592_v48  ;;  %v345_v23 = vld [vmem:[#allocation5 + $0x100] sm:$0xff]  ;;  %v90_v27 = vld [vmem:[#allocation2 + $0x108] sm:$0xff]  ;;  %v91_v32 = vld [vmem:[#allocation2 + $0x110] sm:$0xff] }
  0x33   :  { %v346_v28 = vld [vmem:[#allocation5 + $0x108] sm:$0xff]  ;;  %v347_v33 = vld [vmem:[#allocation5 + $0x110] sm:$0xff]  ;;  %v92_v37 = vld [vmem:[#allocation2 + $0x118] sm:$0xff] }
  0x34   :  { %v1091_v5 = vadd.f32 %v1090_v0, %v835_v58  ;;  %v594_v58 = vsub.f32 %v82_v51, %v338_v52  ;;  %v849_v0 = vmul.f32 %v593_v53, %v593_v53  ;;  %v348_v38 = vld [vmem:[#allocation5 + $0x118] sm:$0xff]  ;;  %v93_v42 = vld [vmem:[#allocation2 + $0x120] sm:$0xff]  ;;  %v94_v47 = vld [vmem:[#allocation2 + $0x128] sm:$0xff] }
  0x35   :  { %v349_v43 = vld [vmem:[#allocation5 + $0x120] sm:$0xff]  ;;  %v350_v48 = vld [vmem:[#allocation5 + $0x128] sm:$0xff]  ;;  %v95_v52 = vld [vmem:[#allocation2 + $0x130] sm:$0xff] }
  0x36   :  { %v1092_v10 = vadd.f32 %v1091_v5, %v836_v63  ;;  %v595_v63 = vsub.f32 %v83_v56, %v339_v57  ;;  %v850_v5 = vmul.f32 %v594_v58, %v594_v58  ;;  %v351_v53 = vld [vmem:[#allocation5 + $0x130] sm:$0xff]  ;;  %v96_v57 = vld [vmem:[#allocation2 + $0x138] sm:$0xff] }
  0x37   :  { %v352_v58 = vld [vmem:[#allocation5 + $0x138] sm:$0xff] }
  0x38   :  { %v1093_v15 = vadd.f32 %v1092_v10, %v837_v4  ;;  %v596_v4 = vsub.f32 %v84_v61, %v340_v62  ;;  %v851_v10 = vmul.f32 %v595_v63, %v595_v63  ;;  %v97_v62 = vld [vmem:[#allocation2 + $0x140] sm:$0xff] }
  0x39   :  { %v353_v63 = vld [vmem:[#allocation5 + $0x140] sm:$0xff] }
  0x3a   :  { %v1094_v20 = vadd.f32 %v1093_v15, %v838_v9  ;;  %v597_v9 = vsub.f32 %v85_v2, %v341_v3  ;;  %v852_v15 = vmul.f32 %v596_v4, %v596_v4  ;;  %v98_v3 = vld [vmem:[#allocation2 + $0x148] sm:$0xff] }
  0x3b   :  { %v354_v4 = vld [vmem:[#allocation5 + $0x148] sm:$0xff] }
  0x3c   :  { %v1095_v25 = vadd.f32 %v1094_v20, %v839_v14  ;;  %v598_v14 = vsub.f32 %v86_v7, %v342_v8  ;;  %v853_v20 = vmul.f32 %v597_v9, %v597_v9  ;;  %v99_v8 = vld [vmem:[#allocation2 + $0x150] sm:$0xff] }
  0x3d   :  { %v355_v9 = vld [vmem:[#allocation5 + $0x150] sm:$0xff] }
  0x3e   :  { %v1096_v30 = vadd.f32 %v1095_v25, %v840_v19  ;;  %v599_v19 = vsub.f32 %v87_v12, %v343_v13  ;;  %v854_v25 = vmul.f32 %v598_v14, %v598_v14  ;;  %v100_v13 = vld [vmem:[#allocation2 + $0x158] sm:$0xff] }
  0x3f   :  { %v356_v14 = vld [vmem:[#allocation5 + $0x158] sm:$0xff] }
  0x40   :  { %v1097_v35 = vadd.f32 %v1096_v30, %v841_v24  ;;  %v600_v24 = vsub.f32 %v88_v17, %v344_v18  ;;  %v855_v30 = vmul.f32 %v599_v19, %v599_v19  ;;  %v101_v18 = vld [vmem:[#allocation2 + $0x160] sm:$0xff] }
  0x41   :  { %v357_v19 = vld [vmem:[#allocation5 + $0x160] sm:$0xff] }
  0x42   :  { %v1098_v40 = vadd.f32 %v1097_v35, %v842_v29  ;;  %v601_v29 = vsub.f32 %v89_v22, %v345_v23  ;;  %v856_v35 = vmul.f32 %v600_v24, %v600_v24  ;;  %v102_v23 = vld [vmem:[#allocation2 + $0x168] sm:$0xff] }
  0x43   :  { %v358_v24 = vld [vmem:[#allocation5 + $0x168] sm:$0xff] }
  0x44   :  { %v1099_v45 = vadd.f32 %v1098_v40, %v843_v34  ;;  %v602_v34 = vsub.f32 %v90_v27, %v346_v28  ;;  %v857_v40 = vmul.f32 %v601_v29, %v601_v29  ;;  %v103_v28 = vld [vmem:[#allocation2 + $0x170] sm:$0xff] }
  0x45   :  { %v359_v29 = vld [vmem:[#allocation5 + $0x170] sm:$0xff] }
  0x46   :  { %v1100_v50 = vadd.f32 %v1099_v45, %v844_v39  ;;  %v603_v39 = vsub.f32 %v91_v32, %v347_v33  ;;  %v858_v45 = vmul.f32 %v602_v34, %v602_v34  ;;  %v104_v33 = vld [vmem:[#allocation2 + $0x178] sm:$0xff] }
  0x47   :  { %v360_v34 = vld [vmem:[#allocation5 + $0x178] sm:$0xff] }
  0x48   :  { %v1101_v55 = vadd.f32 %v1100_v50, %v845_v44  ;;  %v604_v44 = vsub.f32 %v92_v37, %v348_v38  ;;  %v859_v50 = vmul.f32 %v603_v39, %v603_v39  ;;  %v105_v38 = vld [vmem:[#allocation2 + $0x180] sm:$0xff] }
  0x49   :  { %v361_v39 = vld [vmem:[#allocation5 + $0x180] sm:$0xff] }
  0x4a   :  { %v1102_v60 = vadd.f32 %v1101_v55, %v846_v49  ;;  %v605_v49 = vsub.f32 %v93_v42, %v349_v43  ;;  %v860_v55 = vmul.f32 %v604_v44, %v604_v44  ;;  %v106_v43 = vld [vmem:[#allocation2 + $0x188] sm:$0xff] }
  0x4b   :  { %v362_v44 = vld [vmem:[#allocation5 + $0x188] sm:$0xff] }
  0x4c   :  { %v1103_v1 = vadd.f32 %v1102_v60, %v847_v54  ;;  %v606_v54 = vsub.f32 %v94_v47, %v350_v48  ;;  %v861_v60 = vmul.f32 %v605_v49, %v605_v49  ;;  %v107_v48 = vld [vmem:[#allocation2 + $0x190] sm:$0xff] }
  0x4d   :  { %v363_v49 = vld [vmem:[#allocation5 + $0x190] sm:$0xff] }
  0x4e   :  { %v1104_v6 = vadd.f32 %v1103_v1, %v848_v59  ;;  %v607_v59 = vsub.f32 %v95_v52, %v351_v53  ;;  %v862_v1 = vmul.f32 %v606_v54, %v606_v54  ;;  %v108_v53 = vld [vmem:[#allocation2 + $0x198] sm:$0xff] }
  0x4f   :  { %v364_v54 = vld [vmem:[#allocation5 + $0x198] sm:$0xff] }
  0x50   :  { %v1105_v11 = vadd.f32 %v1104_v6, %v849_v0  ;;  %v608_v0 = vsub.f32 %v96_v57, %v352_v58  ;;  %v863_v6 = vmul.f32 %v607_v59, %v607_v59  ;;  %v109_v58 = vld [vmem:[#allocation2 + $0x1a0] sm:$0xff] }
  0x51   :  { %v365_v59 = vld [vmem:[#allocation5 + $0x1a0] sm:$0xff] }
  0x52   :  { %v1106_v16 = vadd.f32 %v1105_v11, %v850_v5  ;;  %v609_v5 = vsub.f32 %v97_v62, %v353_v63  ;;  %v864_v11 = vmul.f32 %v608_v0, %v608_v0  ;;  %v110_v63 = vld [vmem:[#allocation2 + $0x1a8] sm:$0xff] }
  0x53   :  { %v366_v0 = vld [vmem:[#allocation5 + $0x1a8] sm:$0xff] }
  0x54   :  { %v1107_v21 = vadd.f32 %v1106_v16, %v851_v10  ;;  %v610_v10 = vsub.f32 %v98_v3, %v354_v4  ;;  %v865_v16 = vmul.f32 %v609_v5, %v609_v5  ;;  %v111_v4 = vld [vmem:[#allocation2 + $0x1b0] sm:$0xff] }
  0x55   :  { %v367_v5 = vld [vmem:[#allocation5 + $0x1b0] sm:$0xff] }
  0x56   :  { %v1108_v26 = vadd.f32 %v1107_v21, %v852_v15  ;;  %v611_v15 = vsub.f32 %v99_v8, %v355_v9  ;;  %v866_v21 = vmul.f32 %v610_v10, %v610_v10  ;;  %v112_v9 = vld [vmem:[#allocation2 + $0x1b8] sm:$0xff] }
  0x57   :  { %v368_v10 = vld [vmem:[#allocation5 + $0x1b8] sm:$0xff] }
  0x58   :  { %v1109_v31 = vadd.f32 %v1108_v26, %v853_v20  ;;  %v612_v20 = vsub.f32 %v100_v13, %v356_v14  ;;  %v867_v26 = vmul.f32 %v611_v15, %v611_v15  ;;  %v113_v14 = vld [vmem:[#allocation2 + $0x1c0] sm:$0xff] }
  0x59   :  { %v369_v15 = vld [vmem:[#allocation5 + $0x1c0] sm:$0xff] }
  0x5a   :  { %v1110_v36 = vadd.f32 %v1109_v31, %v854_v25  ;;  %v613_v25 = vsub.f32 %v101_v18, %v357_v19  ;;  %v868_v31 = vmul.f32 %v612_v20, %v612_v20  ;;  %v114_v19 = vld [vmem:[#allocation2 + $0x1c8] sm:$0xff] }
  0x5b   :  { %v370_v20 = vld [vmem:[#allocation5 + $0x1c8] sm:$0xff] }
  0x5c   :  { %v1111_v41 = vadd.f32 %v1110_v36, %v855_v30  ;;  %v614_v30 = vsub.f32 %v102_v23, %v358_v24  ;;  %v869_v36 = vmul.f32 %v613_v25, %v613_v25  ;;  %v115_v24 = vld [vmem:[#allocation2 + $0x1d0] sm:$0xff] }
  0x5d   :  { %v371_v25 = vld [vmem:[#allocation5 + $0x1d0] sm:$0xff] }
  0x5e   :  { %v1112_v46 = vadd.f32 %v1111_v41, %v856_v35  ;;  %v615_v35 = vsub.f32 %v103_v28, %v359_v29  ;;  %v870_v41 = vmul.f32 %v614_v30, %v614_v30  ;;  %v116_v29 = vld [vmem:[#allocation2 + $0x1d8] sm:$0xff] }
  0x5f   :  { %v372_v30 = vld [vmem:[#allocation5 + $0x1d8] sm:$0xff] }
  0x60   :  { %v1113_v51 = vadd.f32 %v1112_v46, %v857_v40  ;;  %v616_v40 = vsub.f32 %v104_v33, %v360_v34  ;;  %v871_v46 = vmul.f32 %v615_v35, %v615_v35  ;;  %v117_v34 = vld [vmem:[#allocation2 + $0x1e0] sm:$0xff] }
  0x61   :  { %v373_v35 = vld [vmem:[#allocation5 + $0x1e0] sm:$0xff] }
  0x62   :  { %v1114_v56 = vadd.f32 %v1113_v51, %v858_v45  ;;  %v617_v45 = vsub.f32 %v105_v38, %v361_v39  ;;  %v872_v51 = vmul.f32 %v616_v40, %v616_v40  ;;  %v118_v39 = vld [vmem:[#allocation2 + $0x1e8] sm:$0xff] }
  0x63   :  { %v374_v40 = vld [vmem:[#allocation5 + $0x1e8] sm:$0xff] }
  0x64   :  { %v1115_v61 = vadd.f32 %v1114_v56, %v859_v50  ;;  %v618_v50 = vsub.f32 %v106_v43, %v362_v44  ;;  %v873_v56 = vmul.f32 %v617_v45, %v617_v45  ;;  %v119_v44 = vld [vmem:[#allocation2 + $0x1f0] sm:$0xff] }
  0x65   :  { %v375_v45 = vld [vmem:[#allocation5 + $0x1f0] sm:$0xff] }
  0x66   :  { %v1116_v2 = vadd.f32 %v1115_v61, %v860_v55  ;;  %v619_v55 = vsub.f32 %v107_v48, %v363_v49  ;;  %v874_v61 = vmul.f32 %v618_v50, %v618_v50  ;;  %v120_v49 = vld [vmem:[#allocation2 + $0x1f8] sm:$0xff] }
  0x67   :  { %v376_v50 = vld [vmem:[#allocation5 + $0x1f8] sm:$0xff] }
  0x68   :  { %v1117_v7 = vadd.f32 %v1116_v2, %v861_v60  ;;  %v620_v60 = vsub.f32 %v108_v53, %v364_v54  ;;  %v875_v2 = vmul.f32 %v619_v55, %v619_v55  ;;  %v121_v54 = vld [vmem:[#allocation2 + $0x200] sm:$0xff] }
  0x69   :  { %v377_v55 = vld [vmem:[#allocation5 + $0x200] sm:$0xff] }
  0x6a   :  { %v1118_v12 = vadd.f32 %v1117_v7, %v862_v1  ;;  %v621_v1 = vsub.f32 %v109_v58, %v365_v59  ;;  %v876_v7 = vmul.f32 %v620_v60, %v620_v60  ;;  %v122_v59 = vld [vmem:[#allocation2 + $0x208] sm:$0xff] }
  0x6b   :  { %v378_v60 = vld [vmem:[#allocation5 + $0x208] sm:$0xff] }
  0x6c   :  { %v1119_v17 = vadd.f32 %v1118_v12, %v863_v6  ;;  %v622_v6 = vsub.f32 %v110_v63, %v366_v0  ;;  %v877_v12 = vmul.f32 %v621_v1, %v621_v1  ;;  %v123_v0 = vld [vmem:[#allocation2 + $0x210] sm:$0xff] }
  0x6d   :  { %v379_v1 = vld [vmem:[#allocation5 + $0x210] sm:$0xff] }
  0x6e   :  { %v1120_v22 = vadd.f32 %v1119_v17, %v864_v11  ;;  %v623_v11 = vsub.f32 %v111_v4, %v367_v5  ;;  %v878_v17 = vmul.f32 %v622_v6, %v622_v6  ;;  %v124_v5 = vld [vmem:[#allocation2 + $0x218] sm:$0xff] }
  0x6f   :  { %v380_v6 = vld [vmem:[#allocation5 + $0x218] sm:$0xff] }
  0x70   :  { %v1121_v27 = vadd.f32 %v1120_v22, %v865_v16  ;;  %v624_v16 = vsub.f32 %v112_v9, %v368_v10  ;;  %v879_v22 = vmul.f32 %v623_v11, %v623_v11  ;;  %v125_v10 = vld [vmem:[#allocation2 + $0x220] sm:$0xff] }
  0x71   :  { %v381_v11 = vld [vmem:[#allocation5 + $0x220] sm:$0xff] }
  0x72   :  { %v1122_v32 = vadd.f32 %v1121_v27, %v866_v21  ;;  %v625_v21 = vsub.f32 %v113_v14, %v369_v15  ;;  %v880_v27 = vmul.f32 %v624_v16, %v624_v16  ;;  %v126_v15 = vld [vmem:[#allocation2 + $0x228] sm:$0xff] }
  0x73   :  { %v382_v16 = vld [vmem:[#allocation5 + $0x228] sm:$0xff] }
  0x74   :  { %v1123_v37 = vadd.f32 %v1122_v32, %v867_v26  ;;  %v626_v26 = vsub.f32 %v114_v19, %v370_v20  ;;  %v881_v32 = vmul.f32 %v625_v21, %v625_v21  ;;  %v127_v20 = vld [vmem:[#allocation2 + $0x230] sm:$0xff] }
  0x75   :  { %v383_v21 = vld [vmem:[#allocation5 + $0x230] sm:$0xff] }
  0x76   :  { %v1124_v42 = vadd.f32 %v1123_v37, %v868_v31  ;;  %v627_v31 = vsub.f32 %v115_v24, %v371_v25  ;;  %v882_v37 = vmul.f32 %v626_v26, %v626_v26  ;;  %v128_v25 = vld [vmem:[#allocation2 + $0x238] sm:$0xff] }
  0x77   :  { %v384_v26 = vld [vmem:[#allocation5 + $0x238] sm:$0xff] }
  0x78   :  { %v1125_v47 = vadd.f32 %v1124_v42, %v869_v36  ;;  %v628_v36 = vsub.f32 %v116_v29, %v372_v30  ;;  %v883_v42 = vmul.f32 %v627_v31, %v627_v31  ;;  %v129_v30 = vld [vmem:[#allocation2 + $0x240] sm:$0xff] }
  0x79   :  { %v385_v31 = vld [vmem:[#allocation5 + $0x240] sm:$0xff] }
  0x7a   :  { %v1126_v52 = vadd.f32 %v1125_v47, %v870_v41  ;;  %v629_v41 = vsub.f32 %v117_v34, %v373_v35  ;;  %v884_v47 = vmul.f32 %v628_v36, %v628_v36  ;;  %v130_v35 = vld [vmem:[#allocation2 + $0x248] sm:$0xff] }
  0x7b   :  { %v386_v36 = vld [vmem:[#allocation5 + $0x248] sm:$0xff] }
  0x7c   :  { %v1127_v57 = vadd.f32 %v1126_v52, %v871_v46  ;;  %v630_v46 = vsub.f32 %v118_v39, %v374_v40  ;;  %v885_v52 = vmul.f32 %v629_v41, %v629_v41  ;;  %v131_v40 = vld [vmem:[#allocation2 + $0x250] sm:$0xff] }
  0x7d   :  { %v387_v41 = vld [vmem:[#allocation5 + $0x250] sm:$0xff] }
  0x7e   :  { %v1128_v62 = vadd.f32 %v1127_v57, %v872_v51  ;;  %v631_v51 = vsub.f32 %v119_v44, %v375_v45  ;;  %v886_v57 = vmul.f32 %v630_v46, %v630_v46  ;;  %v132_v45 = vld [vmem:[#allocation2 + $0x258] sm:$0xff] }
  0x7f   :  { %v388_v46 = vld [vmem:[#allocation5 + $0x258] sm:$0xff] }
  0x80   :  { %v1129_v3 = vadd.f32 %v1128_v62, %v873_v56  ;;  %v632_v56 = vsub.f32 %v120_v49, %v376_v50  ;;  %v887_v62 = vmul.f32 %v631_v51, %v631_v51  ;;  %v133_v50 = vld [vmem:[#allocation2 + $0x260] sm:$0xff] }
  0x81   :  { %v389_v51 = vld [vmem:[#allocation5 + $0x260] sm:$0xff] }
  0x82   :  { %v1130_v8 = vadd.f32 %v1129_v3, %v874_v61  ;;  %v633_v61 = vsub.f32 %v121_v54, %v377_v55  ;;  %v888_v3 = vmul.f32 %v632_v56, %v632_v56  ;;  %v134_v55 = vld [vmem:[#allocation2 + $0x268] sm:$0xff] }
  0x83   :  { %v390_v56 = vld [vmem:[#allocation5 + $0x268] sm:$0xff] }
  0x84   :  { %v1131_v13 = vadd.f32 %v1130_v8, %v875_v2  ;;  %v634_v2 = vsub.f32 %v122_v59, %v378_v60  ;;  %v889_v8 = vmul.f32 %v633_v61, %v633_v61  ;;  %v135_v60 = vld [vmem:[#allocation2 + $0x270] sm:$0xff] }
  0x85   :  { %v391_v61 = vld [vmem:[#allocation5 + $0x270] sm:$0xff] }
  0x86   :  { %v1132_v18 = vadd.f32 %v1131_v13, %v876_v7  ;;  %v635_v7 = vsub.f32 %v123_v0, %v379_v1  ;;  %v890_v13 = vmul.f32 %v634_v2, %v634_v2  ;;  %v136_v1 = vld [vmem:[#allocation2 + $0x278] sm:$0xff] }
  0x87   :  { %v392_v2 = vld [vmem:[#allocation5 + $0x278] sm:$0xff] }
  0x88   :  { %v1133_v23 = vadd.f32 %v1132_v18, %v877_v12  ;;  %v636_v12 = vsub.f32 %v124_v5, %v380_v6  ;;  %v891_v18 = vmul.f32 %v635_v7, %v635_v7  ;;  %v137_v6 = vld [vmem:[#allocation2 + $0x280] sm:$0xff] }
  0x89   :  { %v393_v7 = vld [vmem:[#allocation5 + $0x280] sm:$0xff] }
  0x8a   :  { %v1134_v28 = vadd.f32 %v1133_v23, %v878_v17  ;;  %v637_v17 = vsub.f32 %v125_v10, %v381_v11  ;;  %v892_v23 = vmul.f32 %v636_v12, %v636_v12  ;;  %v138_v11 = vld [vmem:[#allocation2 + $0x288] sm:$0xff] }
  0x8b   :  { %v394_v12 = vld [vmem:[#allocation5 + $0x288] sm:$0xff] }
  0x8c   :  { %v1135_v33 = vadd.f32 %v1134_v28, %v879_v22  ;;  %v638_v22 = vsub.f32 %v126_v15, %v382_v16  ;;  %v893_v28 = vmul.f32 %v637_v17, %v637_v17  ;;  %v139_v16 = vld [vmem:[#allocation2 + $0x290] sm:$0xff] }
  0x8d   :  { %v395_v17 = vld [vmem:[#allocation5 + $0x290] sm:$0xff] }
  0x8e   :  { %v1136_v38 = vadd.f32 %v1135_v33, %v880_v27  ;;  %v639_v27 = vsub.f32 %v127_v20, %v383_v21  ;;  %v894_v33 = vmul.f32 %v638_v22, %v638_v22  ;;  %v140_v21 = vld [vmem:[#allocation2 + $0x298] sm:$0xff] }
  0x8f   :  { %v396_v22 = vld [vmem:[#allocation5 + $0x298] sm:$0xff] }
  0x90   :  { %v1137_v43 = vadd.f32 %v1136_v38, %v881_v32  ;;  %v640_v32 = vsub.f32 %v128_v25, %v384_v26  ;;  %v895_v38 = vmul.f32 %v639_v27, %v639_v27  ;;  %v141_v26 = vld [vmem:[#allocation2 + $0x2a0] sm:$0xff] }
  0x91   :  { %v397_v27 = vld [vmem:[#allocation5 + $0x2a0] sm:$0xff] }
  0x92   :  { %v1138_v48 = vadd.f32 %v1137_v43, %v882_v37  ;;  %v641_v37 = vsub.f32 %v129_v30, %v385_v31  ;;  %v896_v43 = vmul.f32 %v640_v32, %v640_v32  ;;  %v142_v31 = vld [vmem:[#allocation2 + $0x2a8] sm:$0xff] }
  0x93   :  { %v398_v32 = vld [vmem:[#allocation5 + $0x2a8] sm:$0xff] }
  0x94   :  { %v1139_v53 = vadd.f32 %v1138_v48, %v883_v42  ;;  %v642_v42 = vsub.f32 %v130_v35, %v386_v36  ;;  %v897_v48 = vmul.f32 %v641_v37, %v641_v37  ;;  %v143_v36 = vld [vmem:[#allocation2 + $0x2b0] sm:$0xff] }
  0x95   :  { %v399_v37 = vld [vmem:[#allocation5 + $0x2b0] sm:$0xff] }
  0x96   :  { %v1140_v58 = vadd.f32 %v1139_v53, %v884_v47  ;;  %v643_v47 = vsub.f32 %v131_v40, %v387_v41  ;;  %v898_v53 = vmul.f32 %v642_v42, %v642_v42  ;;  %v144_v41 = vld [vmem:[#allocation2 + $0x2b8] sm:$0xff] }
  0x97   :  { %v400_v42 = vld [vmem:[#allocation5 + $0x2b8] sm:$0xff] }
  0x98   :  { %v1141_v63 = vadd.f32 %v1140_v58, %v885_v52  ;;  %v644_v52 = vsub.f32 %v132_v45, %v388_v46  ;;  %v899_v58 = vmul.f32 %v643_v47, %v643_v47  ;;  %v145_v46 = vld [vmem:[#allocation2 + $0x2c0] sm:$0xff] }
  0x99   :  { %v401_v47 = vld [vmem:[#allocation5 + $0x2c0] sm:$0xff] }
  0x9a   :  { %v1142_v4 = vadd.f32 %v1141_v63, %v886_v57  ;;  %v645_v57 = vsub.f32 %v133_v50, %v389_v51  ;;  %v900_v63 = vmul.f32 %v644_v52, %v644_v52  ;;  %v146_v51 = vld [vmem:[#allocation2 + $0x2c8] sm:$0xff] }
  0x9b   :  { %v402_v52 = vld [vmem:[#allocation5 + $0x2c8] sm:$0xff] }
  0x9c   :  { %v1143_v9 = vadd.f32 %v1142_v4, %v887_v62  ;;  %v646_v62 = vsub.f32 %v134_v55, %v390_v56  ;;  %v901_v4 = vmul.f32 %v645_v57, %v645_v57  ;;  %v147_v56 = vld [vmem:[#allocation2 + $0x2d0] sm:$0xff] }
  0x9d   :  { %v403_v57 = vld [vmem:[#allocation5 + $0x2d0] sm:$0xff] }
  0x9e   :  { %v1144_v14 = vadd.f32 %v1143_v9, %v888_v3  ;;  %v647_v3 = vsub.f32 %v135_v60, %v391_v61  ;;  %v902_v9 = vmul.f32 %v646_v62, %v646_v62  ;;  %v148_v61 = vld [vmem:[#allocation2 + $0x2d8] sm:$0xff] }
  0x9f   :  { %v404_v62 = vld [vmem:[#allocation5 + $0x2d8] sm:$0xff] }
  0xa0   :  { %v1145_v19 = vadd.f32 %v1144_v14, %v889_v8  ;;  %v648_v8 = vsub.f32 %v136_v1, %v392_v2  ;;  %v903_v14 = vmul.f32 %v647_v3, %v647_v3  ;;  %v149_v2 = vld [vmem:[#allocation2 + $0x2e0] sm:$0xff] }
  0xa1   :  { %v405_v3 = vld [vmem:[#allocation5 + $0x2e0] sm:$0xff] }
  0xa2   :  { %v1146_v24 = vadd.f32 %v1145_v19, %v890_v13  ;;  %v649_v13 = vsub.f32 %v137_v6, %v393_v7  ;;  %v904_v19 = vmul.f32 %v648_v8, %v648_v8  ;;  %v150_v7 = vld [vmem:[#allocation2 + $0x2e8] sm:$0xff] }
  0xa3   :  { %v406_v8 = vld [vmem:[#allocation5 + $0x2e8] sm:$0xff] }
  0xa4   :  { %v1147_v29 = vadd.f32 %v1146_v24, %v891_v18  ;;  %v650_v18 = vsub.f32 %v138_v11, %v394_v12  ;;  %v905_v24 = vmul.f32 %v649_v13, %v649_v13  ;;  %v151_v12 = vld [vmem:[#allocation2 + $0x2f0] sm:$0xff] }
  0xa5   :  { %v407_v13 = vld [vmem:[#allocation5 + $0x2f0] sm:$0xff] }
  0xa6   :  { %v1148_v34 = vadd.f32 %v1147_v29, %v892_v23  ;;  %v651_v23 = vsub.f32 %v139_v16, %v395_v17  ;;  %v906_v29 = vmul.f32 %v650_v18, %v650_v18  ;;  %v152_v17 = vld [vmem:[#allocation2 + $0x2f8] sm:$0xff] }
  0xa7   :  { %v408_v18 = vld [vmem:[#allocation5 + $0x2f8] sm:$0xff] }
  0xa8   :  { %v1149_v39 = vadd.f32 %v1148_v34, %v893_v28  ;;  %v652_v28 = vsub.f32 %v140_v21, %v396_v22  ;;  %v907_v34 = vmul.f32 %v651_v23, %v651_v23  ;;  %v153_v22 = vld [vmem:[#allocation2 + $0x300] sm:$0xff] }
  0xa9   :  { %v409_v23 = vld [vmem:[#allocation5 + $0x300] sm:$0xff] }
  0xaa   :  { %v1150_v44 = vadd.f32 %v1149_v39, %v894_v33  ;;  %v653_v33 = vsub.f32 %v141_v26, %v397_v27  ;;  %v908_v39 = vmul.f32 %v652_v28, %v652_v28  ;;  %v154_v27 = vld [vmem:[#allocation2 + $0x308] sm:$0xff] }
  0xab   :  { %v410_v28 = vld [vmem:[#allocation5 + $0x308] sm:$0xff] }
  0xac   :  { %v1151_v49 = vadd.f32 %v1150_v44, %v895_v38  ;;  %v654_v38 = vsub.f32 %v142_v31, %v398_v32  ;;  %v909_v44 = vmul.f32 %v653_v33, %v653_v33  ;;  %v155_v32 = vld [vmem:[#allocation2 + $0x310] sm:$0xff] }
  0xad   :  { %v411_v33 = vld [vmem:[#allocation5 + $0x310] sm:$0xff] }
  0xae   :  { %v1152_v54 = vadd.f32 %v1151_v49, %v896_v43  ;;  %v655_v43 = vsub.f32 %v143_v36, %v399_v37  ;;  %v910_v49 = vmul.f32 %v654_v38, %v654_v38  ;;  %v156_v37 = vld [vmem:[#allocation2 + $0x318] sm:$0xff] }
  0xaf   :  { %v412_v38 = vld [vmem:[#allocation5 + $0x318] sm:$0xff] }
  0xb0   :  { %v1153_v59 = vadd.f32 %v1152_v54, %v897_v48  ;;  %v656_v48 = vsub.f32 %v144_v41, %v400_v42  ;;  %v911_v54 = vmul.f32 %v655_v43, %v655_v43  ;;  %v157_v42 = vld [vmem:[#allocation2 + $0x320] sm:$0xff] }
  0xb1   :  { %v413_v43 = vld [vmem:[#allocation5 + $0x320] sm:$0xff] }
  0xb2   :  { %v1154_v0 = vadd.f32 %v1153_v59, %v898_v53  ;;  %v657_v53 = vsub.f32 %v145_v46, %v401_v47  ;;  %v912_v59 = vmul.f32 %v656_v48, %v656_v48  ;;  %v158_v47 = vld [vmem:[#allocation2 + $0x328] sm:$0xff] }
  0xb3   :  { %v414_v48 = vld [vmem:[#allocation5 + $0x328] sm:$0xff] }
  0xb4   :  { %v1155_v5 = vadd.f32 %v1154_v0, %v899_v58  ;;  %v658_v58 = vsub.f32 %v146_v51, %v402_v52  ;;  %v913_v0 = vmul.f32 %v657_v53, %v657_v53  ;;  %v159_v52 = vld [vmem:[#allocation2 + $0x330] sm:$0xff] }
  0xb5   :  { %v415_v53 = vld [vmem:[#allocation5 + $0x330] sm:$0xff] }
  0xb6   :  { %v1156_v10 = vadd.f32 %v1155_v5, %v900_v63  ;;  %v659_v63 = vsub.f32 %v147_v56, %v403_v57  ;;  %v914_v5 = vmul.f32 %v658_v58, %v658_v58  ;;  %v160_v57 = vld [vmem:[#allocation2 + $0x338] sm:$0xff] }
  0xb7   :  { %v416_v58 = vld [vmem:[#allocation5 + $0x338] sm:$0xff] }
  0xb8   :  { %v1157_v15 = vadd.f32 %v1156_v10, %v901_v4  ;;  %v660_v4 = vsub.f32 %v148_v61, %v404_v62  ;;  %v915_v10 = vmul.f32 %v659_v63, %v659_v63  ;;  %v161_v62 = vld [vmem:[#allocation2 + $0x340] sm:$0xff] }
  0xb9   :  { %v417_v63 = vld [vmem:[#allocation5 + $0x340] sm:$0xff] }
  0xba   :  { %v1158_v20 = vadd.f32 %v1157_v15, %v902_v9  ;;  %v661_v9 = vsub.f32 %v149_v2, %v405_v3  ;;  %v916_v15 = vmul.f32 %v660_v4, %v660_v4  ;;  %v162_v3 = vld [vmem:[#allocation2 + $0x348] sm:$0xff] }
  0xbb   :  { %v418_v4 = vld [vmem:[#allocation5 + $0x348] sm:$0xff] }
  0xbc   :  { %v1159_v25 = vadd.f32 %v1158_v20, %v903_v14  ;;  %v662_v14 = vsub.f32 %v150_v7, %v406_v8  ;;  %v917_v20 = vmul.f32 %v661_v9, %v661_v9  ;;  %v163_v8 = vld [vmem:[#allocation2 + $0x350] sm:$0xff] }
  0xbd   :  { %v419_v9 = vld [vmem:[#allocation5 + $0x350] sm:$0xff] }
  0xbe   :  { %v1160_v30 = vadd.f32 %v1159_v25, %v904_v19  ;;  %v663_v19 = vsub.f32 %v151_v12, %v407_v13  ;;  %v918_v25 = vmul.f32 %v662_v14, %v662_v14  ;;  %v164_v13 = vld [vmem:[#allocation2 + $0x358] sm:$0xff] }
  0xbf   :  { %v420_v14 = vld [vmem:[#allocation5 + $0x358] sm:$0xff] }
  0xc0   :  { %v1161_v35 = vadd.f32 %v1160_v30, %v905_v24  ;;  %v664_v24 = vsub.f32 %v152_v17, %v408_v18  ;;  %v919_v30 = vmul.f32 %v663_v19, %v663_v19  ;;  %v165_v18 = vld [vmem:[#allocation2 + $0x360] sm:$0xff] }
  0xc1   :  { %v421_v19 = vld [vmem:[#allocation5 + $0x360] sm:$0xff] }
  0xc2   :  { %v1162_v40 = vadd.f32 %v1161_v35, %v906_v29  ;;  %v665_v29 = vsub.f32 %v153_v22, %v409_v23  ;;  %v920_v35 = vmul.f32 %v664_v24, %v664_v24  ;;  %v166_v23 = vld [vmem:[#allocation2 + $0x368] sm:$0xff] }
  0xc3   :  { %v422_v24 = vld [vmem:[#allocation5 + $0x368] sm:$0xff] }
  0xc4   :  { %v1163_v45 = vadd.f32 %v1162_v40, %v907_v34  ;;  %v666_v34 = vsub.f32 %v154_v27, %v410_v28  ;;  %v921_v40 = vmul.f32 %v665_v29, %v665_v29  ;;  %v167_v28 = vld [vmem:[#allocation2 + $0x370] sm:$0xff] }
  0xc5   :  { %v423_v29 = vld [vmem:[#allocation5 + $0x370] sm:$0xff] }
  0xc6   :  { %v1164_v50 = vadd.f32 %v1163_v45, %v908_v39  ;;  %v667_v39 = vsub.f32 %v155_v32, %v411_v33  ;;  %v922_v45 = vmul.f32 %v666_v34, %v666_v34  ;;  %v168_v33 = vld [vmem:[#allocation2 + $0x378] sm:$0xff] }
  0xc7   :  { %v424_v34 = vld [vmem:[#allocation5 + $0x378] sm:$0xff] }
  0xc8   :  { %v1165_v55 = vadd.f32 %v1164_v50, %v909_v44  ;;  %v668_v44 = vsub.f32 %v156_v37, %v412_v38  ;;  %v923_v50 = vmul.f32 %v667_v39, %v667_v39  ;;  %v169_v38 = vld [vmem:[#allocation2 + $0x380] sm:$0xff] }
  0xc9   :  { %v425_v39 = vld [vmem:[#allocation5 + $0x380] sm:$0xff] }
  0xca   :  { %v1166_v60 = vadd.f32 %v1165_v55, %v910_v49  ;;  %v669_v49 = vsub.f32 %v157_v42, %v413_v43  ;;  %v924_v55 = vmul.f32 %v668_v44, %v668_v44  ;;  %v170_v43 = vld [vmem:[#allocation2 + $0x388] sm:$0xff] }
  0xcb   :  { %v426_v44 = vld [vmem:[#allocation5 + $0x388] sm:$0xff] }
  0xcc   :  { %v1167_v1 = vadd.f32 %v1166_v60, %v911_v54  ;;  %v670_v54 = vsub.f32 %v158_v47, %v414_v48  ;;  %v925_v60 = vmul.f32 %v669_v49, %v669_v49  ;;  %v171_v48 = vld [vmem:[#allocation2 + $0x390] sm:$0xff] }
  0xcd   :  { %v427_v49 = vld [vmem:[#allocation5 + $0x390] sm:$0xff] }
  0xce   :  { %v1168_v6 = vadd.f32 %v1167_v1, %v912_v59  ;;  %v671_v59 = vsub.f32 %v159_v52, %v415_v53  ;;  %v926_v1 = vmul.f32 %v670_v54, %v670_v54  ;;  %v172_v53 = vld [vmem:[#allocation2 + $0x398] sm:$0xff] }
  0xcf   :  { %v428_v54 = vld [vmem:[#allocation5 + $0x398] sm:$0xff] }
  0xd0   :  { %v1169_v11 = vadd.f32 %v1168_v6, %v913_v0  ;;  %v672_v0 = vsub.f32 %v160_v57, %v416_v58  ;;  %v927_v6 = vmul.f32 %v671_v59, %v671_v59  ;;  %v173_v58 = vld [vmem:[#allocation2 + $0x3a0] sm:$0xff] }
  0xd1   :  { %v429_v59 = vld [vmem:[#allocation5 + $0x3a0] sm:$0xff] }
  0xd2   :  { %v1170_v16 = vadd.f32 %v1169_v11, %v914_v5  ;;  %v673_v5 = vsub.f32 %v161_v62, %v417_v63  ;;  %v928_v11 = vmul.f32 %v672_v0, %v672_v0  ;;  %v174_v63 = vld [vmem:[#allocation2 + $0x3a8] sm:$0xff] }
  0xd3   :  { %v430_v0 = vld [vmem:[#allocation5 + $0x3a8] sm:$0xff] }
  0xd4   :  { %v1171_v21 = vadd.f32 %v1170_v16, %v915_v10  ;;  %v674_v10 = vsub.f32 %v162_v3, %v418_v4  ;;  %v929_v16 = vmul.f32 %v673_v5, %v673_v5  ;;  %v175_v4 = vld [vmem:[#allocation2 + $0x3b0] sm:$0xff] }
  0xd5   :  { %v431_v5 = vld [vmem:[#allocation5 + $0x3b0] sm:$0xff] }
  0xd6   :  { %v1172_v26 = vadd.f32 %v1171_v21, %v916_v15  ;;  %v675_v15 = vsub.f32 %v163_v8, %v419_v9  ;;  %v930_v21 = vmul.f32 %v674_v10, %v674_v10  ;;  %v176_v9 = vld [vmem:[#allocation2 + $0x3b8] sm:$0xff] }
  0xd7   :  { %v432_v10 = vld [vmem:[#allocation5 + $0x3b8] sm:$0xff] }
  0xd8   :  { %v1173_v31 = vadd.f32 %v1172_v26, %v917_v20  ;;  %v676_v20 = vsub.f32 %v164_v13, %v420_v14  ;;  %v931_v26 = vmul.f32 %v675_v15, %v675_v15  ;;  %v177_v14 = vld [vmem:[#allocation2 + $0x3c0] sm:$0xff] }
  0xd9   :  { %v433_v15 = vld [vmem:[#allocation5 + $0x3c0] sm:$0xff] }
  0xda   :  { %v1174_v36 = vadd.f32 %v1173_v31, %v918_v25  ;;  %v677_v25 = vsub.f32 %v165_v18, %v421_v19  ;;  %v932_v31 = vmul.f32 %v676_v20, %v676_v20  ;;  %v178_v19 = vld [vmem:[#allocation2 + $0x3c8] sm:$0xff] }
  0xdb   :  { %v434_v20 = vld [vmem:[#allocation5 + $0x3c8] sm:$0xff] }
  0xdc   :  { %v1175_v41 = vadd.f32 %v1174_v36, %v919_v30  ;;  %v678_v30 = vsub.f32 %v166_v23, %v422_v24  ;;  %v933_v36 = vmul.f32 %v677_v25, %v677_v25  ;;  %v179_v24 = vld [vmem:[#allocation2 + $0x3d0] sm:$0xff] }
  0xdd   :  { %v435_v25 = vld [vmem:[#allocation5 + $0x3d0] sm:$0xff] }
  0xde   :  { %v1176_v46 = vadd.f32 %v1175_v41, %v920_v35  ;;  %v679_v35 = vsub.f32 %v167_v28, %v423_v29  ;;  %v934_v41 = vmul.f32 %v678_v30, %v678_v30  ;;  %v180_v29 = vld [vmem:[#allocation2 + $0x3d8] sm:$0xff] }
  0xdf   :  { %v436_v30 = vld [vmem:[#allocation5 + $0x3d8] sm:$0xff] }
  0xe0   :  { %v1177_v51 = vadd.f32 %v1176_v46, %v921_v40  ;;  %v680_v40 = vsub.f32 %v168_v33, %v424_v34  ;;  %v935_v46 = vmul.f32 %v679_v35, %v679_v35  ;;  %v181_v34 = vld [vmem:[#allocation2 + $0x3e0] sm:$0xff] }
  0xe1   :  { %v437_v35 = vld [vmem:[#allocation5 + $0x3e0] sm:$0xff] }
  0xe2   :  { %v1178_v56 = vadd.f32 %v1177_v51, %v922_v45  ;;  %v681_v45 = vsub.f32 %v169_v38, %v425_v39  ;;  %v936_v51 = vmul.f32 %v680_v40, %v680_v40  ;;  %v182_v39 = vld [vmem:[#allocation2 + $0x3e8] sm:$0xff] }
  0xe3   :  { %v438_v40 = vld [vmem:[#allocation5 + $0x3e8] sm:$0xff] }
  0xe4   :  { %v1179_v61 = vadd.f32 %v1178_v56, %v923_v50  ;;  %v682_v50 = vsub.f32 %v170_v43, %v426_v44  ;;  %v937_v56 = vmul.f32 %v681_v45, %v681_v45  ;;  %v183_v44 = vld [vmem:[#allocation2 + $0x3f0] sm:$0xff] }
  0xe5   :  { %v439_v45 = vld [vmem:[#allocation5 + $0x3f0] sm:$0xff] }
  0xe6   :  { %v1180_v2 = vadd.f32 %v1179_v61, %v924_v55  ;;  %v683_v55 = vsub.f32 %v171_v48, %v427_v49  ;;  %v938_v61 = vmul.f32 %v682_v50, %v682_v50  ;;  %v184_v49 = vld [vmem:[#allocation2 + $0x3f8] sm:$0xff] }
  0xe7   :  { %v440_v50 = vld [vmem:[#allocation5 + $0x3f8] sm:$0xff] }
  0xe8   :  { %v1181_v7 = vadd.f32 %v1180_v2, %v925_v60  ;;  %v684_v60 = vsub.f32 %v172_v53, %v428_v54  ;;  %v939_v2 = vmul.f32 %v683_v55, %v683_v55  ;;  %v185_v54 = vld [vmem:[#allocation2 + $0x400] sm:$0xff] }
  0xe9   :  { %v441_v55 = vld [vmem:[#allocation5 + $0x400] sm:$0xff] }
  0xea   :  { %v1182_v12 = vadd.f32 %v1181_v7, %v926_v1  ;;  %v685_v1 = vsub.f32 %v173_v58, %v429_v59  ;;  %v940_v7 = vmul.f32 %v684_v60, %v684_v60  ;;  %v186_v59 = vld [vmem:[#allocation2 + $0x408] sm:$0xff] }
  0xeb   :  { %v442_v60 = vld [vmem:[#allocation5 + $0x408] sm:$0xff] }
  0xec   :  { %v1183_v17 = vadd.f32 %v1182_v12, %v927_v6  ;;  %v686_v6 = vsub.f32 %v174_v63, %v430_v0  ;;  %v941_v12 = vmul.f32 %v685_v1, %v685_v1  ;;  %v187_v0 = vld [vmem:[#allocation2 + $0x410] sm:$0xff] }
  0xed   :  { %v443_v1 = vld [vmem:[#allocation5 + $0x410] sm:$0xff] }
  0xee   :  { %v1184_v22 = vadd.f32 %v1183_v17, %v928_v11  ;;  %v687_v11 = vsub.f32 %v175_v4, %v431_v5  ;;  %v942_v17 = vmul.f32 %v686_v6, %v686_v6  ;;  %v188_v5 = vld [vmem:[#allocation2 + $0x418] sm:$0xff] }
  0xef   :  { %v444_v6 = vld [vmem:[#allocation5 + $0x418] sm:$0xff] }
  0xf0   :  { %v1185_v27 = vadd.f32 %v1184_v22, %v929_v16  ;;  %v688_v16 = vsub.f32 %v176_v9, %v432_v10  ;;  %v943_v22 = vmul.f32 %v687_v11, %v687_v11  ;;  %v189_v10 = vld [vmem:[#allocation2 + $0x420] sm:$0xff] }
  0xf1   :  { %v445_v11 = vld [vmem:[#allocation5 + $0x420] sm:$0xff] }
  0xf2   :  { %v1186_v32 = vadd.f32 %v1185_v27, %v930_v21  ;;  %v689_v21 = vsub.f32 %v177_v14, %v433_v15  ;;  %v944_v27 = vmul.f32 %v688_v16, %v688_v16  ;;  %v190_v15 = vld [vmem:[#allocation2 + $0x428] sm:$0xff] }
  0xf3   :  { %v446_v16 = vld [vmem:[#allocation5 + $0x428] sm:$0xff] }
  0xf4   :  { %v1187_v37 = vadd.f32 %v1186_v32, %v931_v26  ;;  %v690_v26 = vsub.f32 %v178_v19, %v434_v20  ;;  %v945_v32 = vmul.f32 %v689_v21, %v689_v21  ;;  %v191_v20 = vld [vmem:[#allocation2 + $0x430] sm:$0xff] }
  0xf5   :  { %v447_v21 = vld [vmem:[#allocation5 + $0x430] sm:$0xff] }
  0xf6   :  { %v1188_v42 = vadd.f32 %v1187_v37, %v932_v31  ;;  %v691_v31 = vsub.f32 %v179_v24, %v435_v25  ;;  %v946_v37 = vmul.f32 %v690_v26, %v690_v26  ;;  %v192_v25 = vld [vmem:[#allocation2 + $0x438] sm:$0xff] }
  0xf7   :  { %v448_v26 = vld [vmem:[#allocation5 + $0x438] sm:$0xff] }
  0xf8   :  { %v1189_v47 = vadd.f32 %v1188_v42, %v933_v36  ;;  %v692_v36 = vsub.f32 %v180_v29, %v436_v30  ;;  %v947_v42 = vmul.f32 %v691_v31, %v691_v31  ;;  %v193_v30 = vld [vmem:[#allocation2 + $0x440] sm:$0xff] }
  0xf9   :  { %v449_v31 = vld [vmem:[#allocation5 + $0x440] sm:$0xff] }
  0xfa   :  { %v1190_v52 = vadd.f32 %v1189_v47, %v934_v41  ;;  %v693_v41 = vsub.f32 %v181_v34, %v437_v35  ;;  %v948_v47 = vmul.f32 %v692_v36, %v692_v36  ;;  %v194_v35 = vld [vmem:[#allocation2 + $0x448] sm:$0xff] }
  0xfb   :  { %v450_v36 = vld [vmem:[#allocation5 + $0x448] sm:$0xff] }
  0xfc   :  { %v1191_v57 = vadd.f32 %v1190_v52, %v935_v46  ;;  %v694_v46 = vsub.f32 %v182_v39, %v438_v40  ;;  %v949_v52 = vmul.f32 %v693_v41, %v693_v41  ;;  %v195_v40 = vld [vmem:[#allocation2 + $0x450] sm:$0xff] }
  0xfd   :  { %v451_v41 = vld [vmem:[#allocation5 + $0x450] sm:$0xff] }
  0xfe   :  { %v1192_v62 = vadd.f32 %v1191_v57, %v936_v51  ;;  %v695_v51 = vsub.f32 %v183_v44, %v439_v45  ;;  %v950_v57 = vmul.f32 %v694_v46, %v694_v46  ;;  %v196_v45 = vld [vmem:[#allocation2 + $0x458] sm:$0xff] }
  0xff   :  { %v452_v46 = vld [vmem:[#allocation5 + $0x458] sm:$0xff] }
 0x100   :  { %v1193_v3 = vadd.f32 %v1192_v62, %v937_v56  ;;  %v696_v56 = vsub.f32 %v184_v49, %v440_v50  ;;  %v951_v62 = vmul.f32 %v695_v51, %v695_v51  ;;  %v197_v50 = vld [vmem:[#allocation2 + $0x460] sm:$0xff] }
 0x101   :  { %v453_v51 = vld [vmem:[#allocation5 + $0x460] sm:$0xff] }
 0x102   :  { %v1194_v8 = vadd.f32 %v1193_v3, %v938_v61  ;;  %v697_v61 = vsub.f32 %v185_v54, %v441_v55  ;;  %v952_v3 = vmul.f32 %v696_v56, %v696_v56  ;;  %v198_v55 = vld [vmem:[#allocation2 + $0x468] sm:$0xff] }
 0x103   :  { %v454_v56 = vld [vmem:[#allocation5 + $0x468] sm:$0xff] }
 0x104   :  { %v1195_v13 = vadd.f32 %v1194_v8, %v939_v2  ;;  %v698_v2 = vsub.f32 %v186_v59, %v442_v60  ;;  %v953_v8 = vmul.f32 %v697_v61, %v697_v61  ;;  %v199_v60 = vld [vmem:[#allocation2 + $0x470] sm:$0xff] }
 0x105   :  { %v455_v61 = vld [vmem:[#allocation5 + $0x470] sm:$0xff] }
 0x106   :  { %v1196_v18 = vadd.f32 %v1195_v13, %v940_v7  ;;  %v699_v7 = vsub.f32 %v187_v0, %v443_v1  ;;  %v954_v13 = vmul.f32 %v698_v2, %v698_v2  ;;  %v200_v1 = vld [vmem:[#allocation2 + $0x478] sm:$0xff] }
 0x107   :  { %v456_v2 = vld [vmem:[#allocation5 + $0x478] sm:$0xff] }
 0x108   :  { %v1197_v23 = vadd.f32 %v1196_v18, %v941_v12  ;;  %v700_v12 = vsub.f32 %v188_v5, %v444_v6  ;;  %v955_v18 = vmul.f32 %v699_v7, %v699_v7  ;;  %v201_v6 = vld [vmem:[#allocation2 + $0x480] sm:$0xff] }
 0x109   :  { %v457_v7 = vld [vmem:[#allocation5 + $0x480] sm:$0xff] }
 0x10a   :  { %v1198_v28 = vadd.f32 %v1197_v23, %v942_v17  ;;  %v701_v17 = vsub.f32 %v189_v10, %v445_v11  ;;  %v956_v23 = vmul.f32 %v700_v12, %v700_v12  ;;  %v202_v11 = vld [vmem:[#allocation2 + $0x488] sm:$0xff] }
 0x10b   :  { %v458_v12 = vld [vmem:[#allocation5 + $0x488] sm:$0xff] }
 0x10c   :  { %v1199_v33 = vadd.f32 %v1198_v28, %v943_v22  ;;  %v702_v22 = vsub.f32 %v190_v15, %v446_v16  ;;  %v957_v28 = vmul.f32 %v701_v17, %v701_v17  ;;  %v203_v16 = vld [vmem:[#allocation2 + $0x490] sm:$0xff] }
 0x10d   :  { %v459_v17 = vld [vmem:[#allocation5 + $0x490] sm:$0xff] }
 0x10e   :  { %v1200_v38 = vadd.f32 %v1199_v33, %v944_v27  ;;  %v703_v27 = vsub.f32 %v191_v20, %v447_v21  ;;  %v958_v33 = vmul.f32 %v702_v22, %v702_v22  ;;  %v204_v21 = vld [vmem:[#allocation2 + $0x498] sm:$0xff] }
 0x10f   :  { %v460_v22 = vld [vmem:[#allocation5 + $0x498] sm:$0xff] }
 0x110   :  { %v1201_v43 = vadd.f32 %v1200_v38, %v945_v32  ;;  %v704_v32 = vsub.f32 %v192_v25, %v448_v26  ;;  %v959_v38 = vmul.f32 %v703_v27, %v703_v27  ;;  %v205_v26 = vld [vmem:[#allocation2 + $0x4a0] sm:$0xff] }
 0x111   :  { %v461_v27 = vld [vmem:[#allocation5 + $0x4a0] sm:$0xff] }
 0x112   :  { %v1202_v48 = vadd.f32 %v1201_v43, %v946_v37  ;;  %v705_v37 = vsub.f32 %v193_v30, %v449_v31  ;;  %v960_v43 = vmul.f32 %v704_v32, %v704_v32  ;;  %v206_v31 = vld [vmem:[#allocation2 + $0x4a8] sm:$0xff] }
 0x113   :  { %v462_v32 = vld [vmem:[#allocation5 + $0x4a8] sm:$0xff] }
 0x114   :  { %v1203_v53 = vadd.f32 %v1202_v48, %v947_v42  ;;  %v706_v42 = vsub.f32 %v194_v35, %v450_v36  ;;  %v961_v48 = vmul.f32 %v705_v37, %v705_v37  ;;  %v207_v36 = vld [vmem:[#allocation2 + $0x4b0] sm:$0xff] }
 0x115   :  { %v463_v37 = vld [vmem:[#allocation5 + $0x4b0] sm:$0xff] }
 0x116   :  { %v1204_v58 = vadd.f32 %v1203_v53, %v948_v47  ;;  %v707_v47 = vsub.f32 %v195_v40, %v451_v41  ;;  %v962_v53 = vmul.f32 %v706_v42, %v706_v42  ;;  %v208_v41 = vld [vmem:[#allocation2 + $0x4b8] sm:$0xff] }
 0x117   :  { %v464_v42 = vld [vmem:[#allocation5 + $0x4b8] sm:$0xff] }
 0x118   :  { %v1205_v63 = vadd.f32 %v1204_v58, %v949_v52  ;;  %v708_v52 = vsub.f32 %v196_v45, %v452_v46  ;;  %v963_v58 = vmul.f32 %v707_v47, %v707_v47  ;;  %v209_v46 = vld [vmem:[#allocation2 + $0x4c0] sm:$0xff] }
 0x119   :  { %v465_v47 = vld [vmem:[#allocation5 + $0x4c0] sm:$0xff] }
 0x11a   :  { %v1206_v4 = vadd.f32 %v1205_v63, %v950_v57  ;;  %v709_v57 = vsub.f32 %v197_v50, %v453_v51  ;;  %v964_v63 = vmul.f32 %v708_v52, %v708_v52  ;;  %v210_v51 = vld [vmem:[#allocation2 + $0x4c8] sm:$0xff] }
 0x11b   :  { %v466_v52 = vld [vmem:[#allocation5 + $0x4c8] sm:$0xff] }
 0x11c   :  { %v1207_v9 = vadd.f32 %v1206_v4, %v951_v62  ;;  %v710_v62 = vsub.f32 %v198_v55, %v454_v56  ;;  %v965_v4 = vmul.f32 %v709_v57, %v709_v57  ;;  %v211_v56 = vld [vmem:[#allocation2 + $0x4d0] sm:$0xff] }
 0x11d   :  { %v467_v57 = vld [vmem:[#allocation5 + $0x4d0] sm:$0xff] }
 0x11e   :  { %v1208_v14 = vadd.f32 %v1207_v9, %v952_v3  ;;  %v711_v3 = vsub.f32 %v199_v60, %v455_v61  ;;  %v966_v9 = vmul.f32 %v710_v62, %v710_v62  ;;  %v212_v61 = vld [vmem:[#allocation2 + $0x4d8] sm:$0xff] }
 0x11f   :  { %v468_v62 = vld [vmem:[#allocation5 + $0x4d8] sm:$0xff] }
 0x120   :  { %v1209_v19 = vadd.f32 %v1208_v14, %v953_v8  ;;  %v712_v8 = vsub.f32 %v200_v1, %v456_v2  ;;  %v967_v14 = vmul.f32 %v711_v3, %v711_v3  ;;  %v213_v2 = vld [vmem:[#allocation2 + $0x4e0] sm:$0xff] }
 0x121   :  { %v469_v3 = vld [vmem:[#allocation5 + $0x4e0] sm:$0xff] }
 0x122   :  { %v1210_v24 = vadd.f32 %v1209_v19, %v954_v13  ;;  %v713_v13 = vsub.f32 %v201_v6, %v457_v7  ;;  %v968_v19 = vmul.f32 %v712_v8, %v712_v8  ;;  %v214_v7 = vld [vmem:[#allocation2 + $0x4e8] sm:$0xff] }
 0x123   :  { %v470_v8 = vld [vmem:[#allocation5 + $0x4e8] sm:$0xff] }
 0x124   :  { %v1211_v29 = vadd.f32 %v1210_v24, %v955_v18  ;;  %v714_v18 = vsub.f32 %v202_v11, %v458_v12  ;;  %v969_v24 = vmul.f32 %v713_v13, %v713_v13  ;;  %v215_v12 = vld [vmem:[#allocation2 + $0x4f0] sm:$0xff] }
 0x125   :  { %v471_v13 = vld [vmem:[#allocation5 + $0x4f0] sm:$0xff] }
 0x126   :  { %v1212_v34 = vadd.f32 %v1211_v29, %v956_v23  ;;  %v715_v23 = vsub.f32 %v203_v16, %v459_v17  ;;  %v970_v29 = vmul.f32 %v714_v18, %v714_v18  ;;  %v216_v17 = vld [vmem:[#allocation2 + $0x4f8] sm:$0xff] }
 0x127   :  { %v472_v18 = vld [vmem:[#allocation5 + $0x4f8] sm:$0xff] }
 0x128   :  { %v1213_v39 = vadd.f32 %v1212_v34, %v957_v28  ;;  %v716_v28 = vsub.f32 %v204_v21, %v460_v22  ;;  %v971_v34 = vmul.f32 %v715_v23, %v715_v23  ;;  %v217_v22 = vld [vmem:[#allocation2 + $0x500] sm:$0xff] }
 0x129   :  { %v473_v23 = vld [vmem:[#allocation5 + $0x500] sm:$0xff] }
 0x12a   :  { %v1214_v44 = vadd.f32 %v1213_v39, %v958_v33  ;;  %v717_v33 = vsub.f32 %v205_v26, %v461_v27  ;;  %v972_v39 = vmul.f32 %v716_v28, %v716_v28  ;;  %v218_v27 = vld [vmem:[#allocation2 + $0x508] sm:$0xff] }
 0x12b   :  { %v474_v28 = vld [vmem:[#allocation5 + $0x508] sm:$0xff] }
 0x12c   :  { %v1215_v49 = vadd.f32 %v1214_v44, %v959_v38  ;;  %v718_v38 = vsub.f32 %v206_v31, %v462_v32  ;;  %v973_v44 = vmul.f32 %v717_v33, %v717_v33  ;;  %v219_v32 = vld [vmem:[#allocation2 + $0x510] sm:$0xff] }
 0x12d   :  { %v475_v33 = vld [vmem:[#allocation5 + $0x510] sm:$0xff] }
 0x12e   :  { %v1216_v54 = vadd.f32 %v1215_v49, %v960_v43  ;;  %v719_v43 = vsub.f32 %v207_v36, %v463_v37  ;;  %v974_v49 = vmul.f32 %v718_v38, %v718_v38  ;;  %v220_v37 = vld [vmem:[#allocation2 + $0x518] sm:$0xff] }
 0x12f   :  { %v476_v38 = vld [vmem:[#allocation5 + $0x518] sm:$0xff] }
 0x130   :  { %v1217_v59 = vadd.f32 %v1216_v54, %v961_v48  ;;  %v720_v48 = vsub.f32 %v208_v41, %v464_v42  ;;  %v975_v54 = vmul.f32 %v719_v43, %v719_v43  ;;  %v221_v42 = vld [vmem:[#allocation2 + $0x520] sm:$0xff] }
 0x131   :  { %v477_v43 = vld [vmem:[#allocation5 + $0x520] sm:$0xff] }
 0x132   :  { %v1218_v0 = vadd.f32 %v1217_v59, %v962_v53  ;;  %v721_v53 = vsub.f32 %v209_v46, %v465_v47  ;;  %v976_v59 = vmul.f32 %v720_v48, %v720_v48  ;;  %v222_v47 = vld [vmem:[#allocation2 + $0x528] sm:$0xff] }
 0x133   :  { %v478_v48 = vld [vmem:[#allocation5 + $0x528] sm:$0xff] }
 0x134   :  { %v1219_v5 = vadd.f32 %v1218_v0, %v963_v58  ;;  %v722_v58 = vsub.f32 %v210_v51, %v466_v52  ;;  %v977_v0 = vmul.f32 %v721_v53, %v721_v53  ;;  %v223_v52 = vld [vmem:[#allocation2 + $0x530] sm:$0xff] }
 0x135   :  { %v479_v53 = vld [vmem:[#allocation5 + $0x530] sm:$0xff] }
 0x136   :  { %v1220_v10 = vadd.f32 %v1219_v5, %v964_v63  ;;  %v723_v63 = vsub.f32 %v211_v56, %v467_v57  ;;  %v978_v5 = vmul.f32 %v722_v58, %v722_v58  ;;  %v224_v57 = vld [vmem:[#allocation2 + $0x538] sm:$0xff] }
 0x137   :  { %v480_v58 = vld [vmem:[#allocation5 + $0x538] sm:$0xff] }
 0x138   :  { %v1221_v15 = vadd.f32 %v1220_v10, %v965_v4  ;;  %v724_v4 = vsub.f32 %v212_v61, %v468_v62  ;;  %v979_v10 = vmul.f32 %v723_v63, %v723_v63  ;;  %v225_v62 = vld [vmem:[#allocation2 + $0x540] sm:$0xff] }
 0x139   :  { %v481_v63 = vld [vmem:[#allocation5 + $0x540] sm:$0xff] }
 0x13a   :  { %v1222_v20 = vadd.f32 %v1221_v15, %v966_v9  ;;  %v725_v9 = vsub.f32 %v213_v2, %v469_v3  ;;  %v980_v15 = vmul.f32 %v724_v4, %v724_v4  ;;  %v226_v3 = vld [vmem:[#allocation2 + $0x548] sm:$0xff] }
 0x13b   :  { %v482_v4 = vld [vmem:[#allocation5 + $0x548] sm:$0xff] }
 0x13c   :  { %v1223_v25 = vadd.f32 %v1222_v20, %v967_v14  ;;  %v726_v14 = vsub.f32 %v214_v7, %v470_v8  ;;  %v981_v20 = vmul.f32 %v725_v9, %v725_v9  ;;  %v227_v8 = vld [vmem:[#allocation2 + $0x550] sm:$0xff] }
 0x13d   :  { %v483_v9 = vld [vmem:[#allocation5 + $0x550] sm:$0xff] }
 0x13e   :  { %v1224_v30 = vadd.f32 %v1223_v25, %v968_v19  ;;  %v727_v19 = vsub.f32 %v215_v12, %v471_v13  ;;  %v982_v25 = vmul.f32 %v726_v14, %v726_v14  ;;  %v228_v13 = vld [vmem:[#allocation2 + $0x558] sm:$0xff] }
 0x13f   :  { %v484_v14 = vld [vmem:[#allocation5 + $0x558] sm:$0xff] }
 0x140   :  { %v1225_v35 = vadd.f32 %v1224_v30, %v969_v24  ;;  %v728_v24 = vsub.f32 %v216_v17, %v472_v18  ;;  %v983_v30 = vmul.f32 %v727_v19, %v727_v19  ;;  %v229_v18 = vld [vmem:[#allocation2 + $0x560] sm:$0xff] }
 0x141   :  { %v485_v19 = vld [vmem:[#allocation5 + $0x560] sm:$0xff] }
 0x142   :  { %v1226_v40 = vadd.f32 %v1225_v35, %v970_v29  ;;  %v729_v29 = vsub.f32 %v217_v22, %v473_v23  ;;  %v984_v35 = vmul.f32 %v728_v24, %v728_v24  ;;  %v230_v23 = vld [vmem:[#allocation2 + $0x568] sm:$0xff] }
 0x143   :  { %v486_v24 = vld [vmem:[#allocation5 + $0x568] sm:$0xff] }
 0x144   :  { %v1227_v45 = vadd.f32 %v1226_v40, %v971_v34  ;;  %v730_v34 = vsub.f32 %v218_v27, %v474_v28  ;;  %v985_v40 = vmul.f32 %v729_v29, %v729_v29  ;;  %v231_v28 = vld [vmem:[#allocation2 + $0x570] sm:$0xff] }
 0x145   :  { %v487_v29 = vld [vmem:[#allocation5 + $0x570] sm:$0xff] }
 0x146   :  { %v1228_v50 = vadd.f32 %v1227_v45, %v972_v39  ;;  %v731_v39 = vsub.f32 %v219_v32, %v475_v33  ;;  %v986_v45 = vmul.f32 %v730_v34, %v730_v34  ;;  %v232_v33 = vld [vmem:[#allocation2 + $0x578] sm:$0xff] }
 0x147   :  { %v488_v34 = vld [vmem:[#allocation5 + $0x578] sm:$0xff] }
 0x148   :  { %v1229_v55 = vadd.f32 %v1228_v50, %v973_v44  ;;  %v732_v44 = vsub.f32 %v220_v37, %v476_v38  ;;  %v987_v50 = vmul.f32 %v731_v39, %v731_v39  ;;  %v233_v38 = vld [vmem:[#allocation2 + $0x580] sm:$0xff] }
 0x149   :  { %v489_v39 = vld [vmem:[#allocation5 + $0x580] sm:$0xff] }
 0x14a   :  { %v1230_v60 = vadd.f32 %v1229_v55, %v974_v49  ;;  %v733_v49 = vsub.f32 %v221_v42, %v477_v43  ;;  %v988_v55 = vmul.f32 %v732_v44, %v732_v44  ;;  %v234_v43 = vld [vmem:[#allocation2 + $0x588] sm:$0xff] }
 0x14b   :  { %v490_v44 = vld [vmem:[#allocation5 + $0x588] sm:$0xff] }
 0x14c   :  { %v1231_v1 = vadd.f32 %v1230_v60, %v975_v54  ;;  %v734_v54 = vsub.f32 %v222_v47, %v478_v48  ;;  %v989_v60 = vmul.f32 %v733_v49, %v733_v49  ;;  %v235_v48 = vld [vmem:[#allocation2 + $0x590] sm:$0xff] }
 0x14d   :  { %v491_v49 = vld [vmem:[#allocation5 + $0x590] sm:$0xff] }
 0x14e   :  { %v1232_v6 = vadd.f32 %v1231_v1, %v976_v59  ;;  %v735_v59 = vsub.f32 %v223_v52, %v479_v53  ;;  %v990_v1 = vmul.f32 %v734_v54, %v734_v54  ;;  %v236_v53 = vld [vmem:[#allocation2 + $0x598] sm:$0xff] }
 0x14f   :  { %v492_v54 = vld [vmem:[#allocation5 + $0x598] sm:$0xff] }
 0x150   :  { %v1233_v11 = vadd.f32 %v1232_v6, %v977_v0  ;;  %v736_v0 = vsub.f32 %v224_v57, %v480_v58  ;;  %v991_v6 = vmul.f32 %v735_v59, %v735_v59  ;;  %v237_v58 = vld [vmem:[#allocation2 + $0x5a0] sm:$0xff] }
 0x151   :  { %v493_v59 = vld [vmem:[#allocation5 + $0x5a0] sm:$0xff] }
 0x152   :  { %v1234_v16 = vadd.f32 %v1233_v11, %v978_v5  ;;  %v737_v5 = vsub.f32 %v225_v62, %v481_v63  ;;  %v992_v11 = vmul.f32 %v736_v0, %v736_v0  ;;  %v238_v63 = vld [vmem:[#allocation2 + $0x5a8] sm:$0xff] }
 0x153   :  { %v494_v0 = vld [vmem:[#allocation5 + $0x5a8] sm:$0xff] }
 0x154   :  { %v1235_v21 = vadd.f32 %v1234_v16, %v979_v10  ;;  %v738_v10 = vsub.f32 %v226_v3, %v482_v4  ;;  %v993_v16 = vmul.f32 %v737_v5, %v737_v5  ;;  %v239_v4 = vld [vmem:[#allocation2 + $0x5b0] sm:$0xff] }
 0x155   :  { %v495_v5 = vld [vmem:[#allocation5 + $0x5b0] sm:$0xff] }
 0x156   :  { %v1236_v26 = vadd.f32 %v1235_v21, %v980_v15  ;;  %v739_v15 = vsub.f32 %v227_v8, %v483_v9  ;;  %v994_v21 = vmul.f32 %v738_v10, %v738_v10  ;;  %v240_v9 = vld [vmem:[#allocation2 + $0x5b8] sm:$0xff] }
 0x157   :  { %v496_v10 = vld [vmem:[#allocation5 + $0x5b8] sm:$0xff] }
 0x158   :  { %v1237_v31 = vadd.f32 %v1236_v26, %v981_v20  ;;  %v740_v20 = vsub.f32 %v228_v13, %v484_v14  ;;  %v995_v26 = vmul.f32 %v739_v15, %v739_v15  ;;  %v241_v14 = vld [vmem:[#allocation2 + $0x5c0] sm:$0xff] }
 0x159   :  { %v497_v15 = vld [vmem:[#allocation5 + $0x5c0] sm:$0xff] }
 0x15a   :  { %v1238_v36 = vadd.f32 %v1237_v31, %v982_v25  ;;  %v741_v25 = vsub.f32 %v229_v18, %v485_v19  ;;  %v996_v31 = vmul.f32 %v740_v20, %v740_v20  ;;  %v242_v19 = vld [vmem:[#allocation2 + $0x5c8] sm:$0xff] }
 0x15b   :  { %v498_v20 = vld [vmem:[#allocation5 + $0x5c8] sm:$0xff] }
 0x15c   :  { %v1239_v41 = vadd.f32 %v1238_v36, %v983_v30  ;;  %v742_v30 = vsub.f32 %v230_v23, %v486_v24  ;;  %v997_v36 = vmul.f32 %v741_v25, %v741_v25  ;;  %v243_v24 = vld [vmem:[#allocation2 + $0x5d0] sm:$0xff] }
 0x15d   :  { %v499_v25 = vld [vmem:[#allocation5 + $0x5d0] sm:$0xff] }
 0x15e   :  { %v1240_v46 = vadd.f32 %v1239_v41, %v984_v35  ;;  %v743_v35 = vsub.f32 %v231_v28, %v487_v29  ;;  %v998_v41 = vmul.f32 %v742_v30, %v742_v30  ;;  %v244_v29 = vld [vmem:[#allocation2 + $0x5d8] sm:$0xff] }
 0x15f   :  { %v500_v30 = vld [vmem:[#allocation5 + $0x5d8] sm:$0xff] }
 0x160   :  { %v1241_v51 = vadd.f32 %v1240_v46, %v985_v40  ;;  %v744_v40 = vsub.f32 %v232_v33, %v488_v34  ;;  %v999_v46 = vmul.f32 %v743_v35, %v743_v35  ;;  %v245_v34 = vld [vmem:[#allocation2 + $0x5e0] sm:$0xff] }
 0x161   :  { %v501_v35 = vld [vmem:[#allocation5 + $0x5e0] sm:$0xff] }
 0x162   :  { %v1242_v56 = vadd.f32 %v1241_v51, %v986_v45  ;;  %v745_v45 = vsub.f32 %v233_v38, %v489_v39  ;;  %v1000_v51 = vmul.f32 %v744_v40, %v744_v40  ;;  %v246_v39 = vld [vmem:[#allocation2 + $0x5e8] sm:$0xff] }
 0x163   :  { %v502_v40 = vld [vmem:[#allocation5 + $0x5e8] sm:$0xff] }
 0x164   :  { %v1243_v61 = vadd.f32 %v1242_v56, %v987_v50  ;;  %v746_v50 = vsub.f32 %v234_v43, %v490_v44  ;;  %v1001_v56 = vmul.f32 %v745_v45, %v745_v45  ;;  %v247_v44 = vld [vmem:[#allocation2 + $0x5f0] sm:$0xff] }
 0x165   :  { %v503_v45 = vld [vmem:[#allocation5 + $0x5f0] sm:$0xff] }
 0x166   :  { %v1244_v2 = vadd.f32 %v1243_v61, %v988_v55  ;;  %v747_v55 = vsub.f32 %v235_v48, %v491_v49  ;;  %v1002_v61 = vmul.f32 %v746_v50, %v746_v50  ;;  %v248_v49 = vld [vmem:[#allocation2 + $0x5f8] sm:$0xff] }
 0x167   :  { %v504_v50 = vld [vmem:[#allocation5 + $0x5f8] sm:$0xff] }
 0x168   :  { %v1245_v7 = vadd.f32 %v1244_v2, %v989_v60  ;;  %v748_v60 = vsub.f32 %v236_v53, %v492_v54  ;;  %v1003_v2 = vmul.f32 %v747_v55, %v747_v55  ;;  %v249_v54 = vld [vmem:[#allocation2 + $0x600] sm:$0xff] }
 0x169   :  { %v505_v55 = vld [vmem:[#allocation5 + $0x600] sm:$0xff] }
 0x16a   :  { %v1246_v12 = vadd.f32 %v1245_v7, %v990_v1  ;;  %v749_v1 = vsub.f32 %v237_v58, %v493_v59  ;;  %v1004_v7 = vmul.f32 %v748_v60, %v748_v60  ;;  %v250_v59 = vld [vmem:[#allocation2 + $0x608] sm:$0xff] }
 0x16b   :  { %v506_v60 = vld [vmem:[#allocation5 + $0x608] sm:$0xff] }
 0x16c   :  { %v1247_v17 = vadd.f32 %v1246_v12, %v991_v6  ;;  %v750_v6 = vsub.f32 %v238_v63, %v494_v0  ;;  %v1005_v12 = vmul.f32 %v749_v1, %v749_v1  ;;  %v251_v0 = vld [vmem:[#allocation2 + $0x610] sm:$0xff] }
 0x16d   :  { %v507_v1 = vld [vmem:[#allocation5 + $0x610] sm:$0xff] }
 0x16e   :  { %v1248_v22 = vadd.f32 %v1247_v17, %v992_v11  ;;  %v751_v11 = vsub.f32 %v239_v4, %v495_v5  ;;  %v1006_v17 = vmul.f32 %v750_v6, %v750_v6  ;;  %v252_v5 = vld [vmem:[#allocation2 + $0x618] sm:$0xff] }
 0x16f   :  { %v508_v6 = vld [vmem:[#allocation5 + $0x618] sm:$0xff] }
 0x170   :  { %v1249_v27 = vadd.f32 %v1248_v22, %v993_v16  ;;  %v752_v16 = vsub.f32 %v240_v9, %v496_v10  ;;  %v1007_v22 = vmul.f32 %v751_v11, %v751_v11  ;;  %v253_v10 = vld [vmem:[#allocation2 + $0x620] sm:$0xff] }
 0x171   :  { %v509_v11 = vld [vmem:[#allocation5 + $0x620] sm:$0xff] }
 0x172   :  { %v1250_v32 = vadd.f32 %v1249_v27, %v994_v21  ;;  %v753_v21 = vsub.f32 %v241_v14, %v497_v15  ;;  %v1008_v27 = vmul.f32 %v752_v16, %v752_v16  ;;  %v254_v15 = vld [vmem:[#allocation2 + $0x628] sm:$0xff] }
 0x173   :  { %v510_v16 = vld [vmem:[#allocation5 + $0x628] sm:$0xff] }
 0x174   :  { %v1251_v37 = vadd.f32 %v1250_v32, %v995_v26  ;;  %v754_v26 = vsub.f32 %v242_v19, %v498_v20  ;;  %v1009_v32 = vmul.f32 %v753_v21, %v753_v21  ;;  %v255_v20 = vld [vmem:[#allocation2 + $0x630] sm:$0xff] }
 0x175   :  { %v511_v21 = vld [vmem:[#allocation5 + $0x630] sm:$0xff] }
 0x176   :  { %v1252_v42 = vadd.f32 %v1251_v37, %v996_v31  ;;  %v755_v31 = vsub.f32 %v243_v24, %v499_v25  ;;  %v1010_v37 = vmul.f32 %v754_v26, %v754_v26  ;;  %v256_v25 = vld [vmem:[#allocation2 + $0x638] sm:$0xff] }
 0x177   :  { %v512_v26 = vld [vmem:[#allocation5 + $0x638] sm:$0xff] }
 0x178   :  { %v1253_v47 = vadd.f32 %v1252_v42, %v997_v36  ;;  %v756_v36 = vsub.f32 %v244_v29, %v500_v30  ;;  %v1011_v42 = vmul.f32 %v755_v31, %v755_v31  ;;  %v257_v30 = vld [vmem:[#allocation2 + $0x640] sm:$0xff] }
 0x179   :  { %v513_v31 = vld [vmem:[#allocation5 + $0x640] sm:$0xff] }
 0x17a   :  { %v1254_v52 = vadd.f32 %v1253_v47, %v998_v41  ;;  %v757_v41 = vsub.f32 %v245_v34, %v501_v35  ;;  %v1012_v47 = vmul.f32 %v756_v36, %v756_v36  ;;  %v258_v35 = vld [vmem:[#allocation2 + $0x648] sm:$0xff] }
 0x17b   :  { %v514_v36 = vld [vmem:[#allocation5 + $0x648] sm:$0xff] }
 0x17c   :  { %v1255_v57 = vadd.f32 %v1254_v52, %v999_v46  ;;  %v758_v46 = vsub.f32 %v246_v39, %v502_v40  ;;  %v1013_v52 = vmul.f32 %v757_v41, %v757_v41  ;;  %v259_v40 = vld [vmem:[#allocation2 + $0x650] sm:$0xff] }
 0x17d   :  { %v515_v41 = vld [vmem:[#allocation5 + $0x650] sm:$0xff] }
 0x17e   :  { %v1256_v62 = vadd.f32 %v1255_v57, %v1000_v51  ;;  %v759_v51 = vsub.f32 %v247_v44, %v503_v45  ;;  %v1014_v57 = vmul.f32 %v758_v46, %v758_v46  ;;  %v260_v45 = vld [vmem:[#allocation2 + $0x658] sm:$0xff] }
 0x17f   :  { %v516_v46 = vld [vmem:[#allocation5 + $0x658] sm:$0xff] }
 0x180   :  { %v1257_v3 = vadd.f32 %v1256_v62, %v1001_v56  ;;  %v760_v56 = vsub.f32 %v248_v49, %v504_v50  ;;  %v1015_v62 = vmul.f32 %v759_v51, %v759_v51  ;;  %v261_v50 = vld [vmem:[#allocation2 + $0x660] sm:$0xff] }
 0x181   :  { %v517_v51 = vld [vmem:[#allocation5 + $0x660] sm:$0xff] }
 0x182   :  { %v1258_v8 = vadd.f32 %v1257_v3, %v1002_v61  ;;  %v761_v61 = vsub.f32 %v249_v54, %v505_v55  ;;  %v1016_v3 = vmul.f32 %v760_v56, %v760_v56  ;;  %v262_v55 = vld [vmem:[#allocation2 + $0x668] sm:$0xff] }
 0x183   :  { %v518_v56 = vld [vmem:[#allocation5 + $0x668] sm:$0xff] }
 0x184   :  { %v1259_v13 = vadd.f32 %v1258_v8, %v1003_v2  ;;  %v762_v2 = vsub.f32 %v250_v59, %v506_v60  ;;  %v1017_v8 = vmul.f32 %v761_v61, %v761_v61  ;;  %v263_v60 = vld [vmem:[#allocation2 + $0x670] sm:$0xff] }
 0x185   :  { %v519_v61 = vld [vmem:[#allocation5 + $0x670] sm:$0xff] }
 0x186   :  { %v1260_v18 = vadd.f32 %v1259_v13, %v1004_v7  ;;  %v763_v7 = vsub.f32 %v251_v0, %v507_v1  ;;  %v1018_v13 = vmul.f32 %v762_v2, %v762_v2  ;;  %v264_v1 = vld [vmem:[#allocation2 + $0x678] sm:$0xff] }
 0x187   :  { %v520_v2 = vld [vmem:[#allocation5 + $0x678] sm:$0xff] }
 0x188   :  { %v1261_v23 = vadd.f32 %v1260_v18, %v1005_v12  ;;  %v764_v12 = vsub.f32 %v252_v5, %v508_v6  ;;  %v1019_v18 = vmul.f32 %v763_v7, %v763_v7  ;;  %v265_v6 = vld [vmem:[#allocation2 + $0x680] sm:$0xff] }
 0x189   :  { %v521_v7 = vld [vmem:[#allocation5 + $0x680] sm:$0xff] }
 0x18a   :  { %v1262_v28 = vadd.f32 %v1261_v23, %v1006_v17  ;;  %v765_v17 = vsub.f32 %v253_v10, %v509_v11  ;;  %v1020_v23 = vmul.f32 %v764_v12, %v764_v12  ;;  %v266_v11 = vld [vmem:[#allocation2 + $0x688] sm:$0xff] }
 0x18b   :  { %v522_v12 = vld [vmem:[#allocation5 + $0x688] sm:$0xff] }
 0x18c   :  { %v1263_v33 = vadd.f32 %v1262_v28, %v1007_v22  ;;  %v766_v22 = vsub.f32 %v254_v15, %v510_v16  ;;  %v1021_v28 = vmul.f32 %v765_v17, %v765_v17  ;;  %v267_v16 = vld [vmem:[#allocation2 + $0x690] sm:$0xff] }
 0x18d   :  { %v523_v17 = vld [vmem:[#allocation5 + $0x690] sm:$0xff] }
 0x18e   :  { %v1264_v38 = vadd.f32 %v1263_v33, %v1008_v27  ;;  %v767_v27 = vsub.f32 %v255_v20, %v511_v21  ;;  %v1022_v33 = vmul.f32 %v766_v22, %v766_v22  ;;  %v268_v21 = vld [vmem:[#allocation2 + $0x698] sm:$0xff] }
 0x18f   :  { %v524_v22 = vld [vmem:[#allocation5 + $0x698] sm:$0xff] }
 0x190   :  { %v1265_v43 = vadd.f32 %v1264_v38, %v1009_v32  ;;  %v768_v32 = vsub.f32 %v256_v25, %v512_v26  ;;  %v1023_v38 = vmul.f32 %v767_v27, %v767_v27  ;;  %v269_v26 = vld [vmem:[#allocation2 + $0x6a0] sm:$0xff] }
 0x191   :  { %v525_v27 = vld [vmem:[#allocation5 + $0x6a0] sm:$0xff] }
 0x192   :  { %v1266_v48 = vadd.f32 %v1265_v43, %v1010_v37  ;;  %v769_v37 = vsub.f32 %v257_v30, %v513_v31  ;;  %v1024_v43 = vmul.f32 %v768_v32, %v768_v32  ;;  %v270_v31 = vld [vmem:[#allocation2 + $0x6a8] sm:$0xff] }
 0x193   :  { %v526_v32 = vld [vmem:[#allocation5 + $0x6a8] sm:$0xff] }
 0x194   :  { %v1267_v53 = vadd.f32 %v1266_v48, %v1011_v42  ;;  %v770_v42 = vsub.f32 %v258_v35, %v514_v36  ;;  %v1025_v48 = vmul.f32 %v769_v37, %v769_v37  ;;  %v271_v36 = vld [vmem:[#allocation2 + $0x6b0] sm:$0xff] }
 0x195   :  { %v527_v37 = vld [vmem:[#allocation5 + $0x6b0] sm:$0xff] }
 0x196   :  { %v1268_v58 = vadd.f32 %v1267_v53, %v1012_v47  ;;  %v771_v47 = vsub.f32 %v259_v40, %v515_v41  ;;  %v1026_v53 = vmul.f32 %v770_v42, %v770_v42  ;;  %v272_v41 = vld [vmem:[#allocation2 + $0x6b8] sm:$0xff] }
 0x197   :  { %v528_v42 = vld [vmem:[#allocation5 + $0x6b8] sm:$0xff] }
 0x198   :  { %v1269_v63 = vadd.f32 %v1268_v58, %v1013_v52  ;;  %v772_v52 = vsub.f32 %v260_v45, %v516_v46  ;;  %v1027_v58 = vmul.f32 %v771_v47, %v771_v47  ;;  %v273_v46 = vld [vmem:[#allocation2 + $0x6c0] sm:$0xff] }
 0x199   :  { %v529_v47 = vld [vmem:[#allocation5 + $0x6c0] sm:$0xff] }
 0x19a   :  { %v1270_v4 = vadd.f32 %v1269_v63, %v1014_v57  ;;  %v773_v57 = vsub.f32 %v261_v50, %v517_v51  ;;  %v1028_v63 = vmul.f32 %v772_v52, %v772_v52  ;;  %v274_v51 = vld [vmem:[#allocation2 + $0x6c8] sm:$0xff] }
 0x19b   :  { %v530_v52 = vld [vmem:[#allocation5 + $0x6c8] sm:$0xff] }
 0x19c   :  { %v1271_v9 = vadd.f32 %v1270_v4, %v1015_v62  ;;  %v774_v62 = vsub.f32 %v262_v55, %v518_v56  ;;  %v1029_v4 = vmul.f32 %v773_v57, %v773_v57  ;;  %v275_v56 = vld [vmem:[#allocation2 + $0x6d0] sm:$0xff] }
 0x19d   :  { %v531_v57 = vld [vmem:[#allocation5 + $0x6d0] sm:$0xff] }
 0x19e   :  { %v1272_v14 = vadd.f32 %v1271_v9, %v1016_v3  ;;  %v775_v3 = vsub.f32 %v263_v60, %v519_v61  ;;  %v1030_v9 = vmul.f32 %v774_v62, %v774_v62  ;;  %v276_v61 = vld [vmem:[#allocation2 + $0x6d8] sm:$0xff] }
 0x19f   :  { %v532_v62 = vld [vmem:[#allocation5 + $0x6d8] sm:$0xff] }
 0x1a0   :  { %v1273_v19 = vadd.f32 %v1272_v14, %v1017_v8  ;;  %v776_v8 = vsub.f32 %v264_v1, %v520_v2  ;;  %v1031_v14 = vmul.f32 %v775_v3, %v775_v3  ;;  %v277_v2 = vld [vmem:[#allocation2 + $0x6e0] sm:$0xff] }
 0x1a1   :  { %v533_v3 = vld [vmem:[#allocation5 + $0x6e0] sm:$0xff] }
 0x1a2   :  { %v1274_v24 = vadd.f32 %v1273_v19, %v1018_v13  ;;  %v777_v13 = vsub.f32 %v265_v6, %v521_v7  ;;  %v1032_v19 = vmul.f32 %v776_v8, %v776_v8  ;;  %v278_v7 = vld [vmem:[#allocation2 + $0x6e8] sm:$0xff] }
 0x1a3   :  { %v534_v8 = vld [vmem:[#allocation5 + $0x6e8] sm:$0xff] }
 0x1a4   :  { %v1275_v29 = vadd.f32 %v1274_v24, %v1019_v18  ;;  %v778_v18 = vsub.f32 %v266_v11, %v522_v12  ;;  %v1033_v24 = vmul.f32 %v777_v13, %v777_v13  ;;  %v279_v12 = vld [vmem:[#allocation2 + $0x6f0] sm:$0xff] }
 0x1a5   :  { %v535_v13 = vld [vmem:[#allocation5 + $0x6f0] sm:$0xff] }
 0x1a6   :  { %v1276_v34 = vadd.f32 %v1275_v29, %v1020_v23  ;;  %v779_v23 = vsub.f32 %v267_v16, %v523_v17  ;;  %v1034_v29 = vmul.f32 %v778_v18, %v778_v18  ;;  %v280_v17 = vld [vmem:[#allocation2 + $0x6f8] sm:$0xff] }
 0x1a7   :  { %v536_v18 = vld [vmem:[#allocation5 + $0x6f8] sm:$0xff] }
 0x1a8   :  { %v1277_v39 = vadd.f32 %v1276_v34, %v1021_v28  ;;  %v780_v28 = vsub.f32 %v268_v21, %v524_v22  ;;  %v1035_v34 = vmul.f32 %v779_v23, %v779_v23  ;;  %v281_v22 = vld [vmem:[#allocation2 + $0x700] sm:$0xff] }
 0x1a9   :  { %v537_v23 = vld [vmem:[#allocation5 + $0x700] sm:$0xff] }
 0x1aa   :  { %v1278_v44 = vadd.f32 %v1277_v39, %v1022_v33  ;;  %v781_v33 = vsub.f32 %v269_v26, %v525_v27  ;;  %v1036_v39 = vmul.f32 %v780_v28, %v780_v28  ;;  %v282_v27 = vld [vmem:[#allocation2 + $0x708] sm:$0xff] }
 0x1ab   :  { %v538_v28 = vld [vmem:[#allocation5 + $0x708] sm:$0xff] }
 0x1ac   :  { %v1279_v49 = vadd.f32 %v1278_v44, %v1023_v38  ;;  %v782_v38 = vsub.f32 %v270_v31, %v526_v32  ;;  %v1037_v44 = vmul.f32 %v781_v33, %v781_v33  ;;  %v283_v32 = vld [vmem:[#allocation2 + $0x710] sm:$0xff] }
 0x1ad   :  { %v539_v33 = vld [vmem:[#allocation5 + $0x710] sm:$0xff] }
 0x1ae   :  { %v1280_v54 = vadd.f32 %v1279_v49, %v1024_v43  ;;  %v783_v43 = vsub.f32 %v271_v36, %v527_v37  ;;  %v1038_v49 = vmul.f32 %v782_v38, %v782_v38  ;;  %v284_v37 = vld [vmem:[#allocation2 + $0x718] sm:$0xff] }
 0x1af   :  { %v540_v38 = vld [vmem:[#allocation5 + $0x718] sm:$0xff] }
 0x1b0   :  { %v1281_v59 = vadd.f32 %v1280_v54, %v1025_v48  ;;  %v784_v48 = vsub.f32 %v272_v41, %v528_v42  ;;  %v1039_v54 = vmul.f32 %v783_v43, %v783_v43  ;;  %v285_v42 = vld [vmem:[#allocation2 + $0x720] sm:$0xff] }
 0x1b1   :  { %v541_v43 = vld [vmem:[#allocation5 + $0x720] sm:$0xff] }
 0x1b2   :  { %v1282_v0 = vadd.f32 %v1281_v59, %v1026_v53  ;;  %v785_v53 = vsub.f32 %v273_v46, %v529_v47  ;;  %v1040_v59 = vmul.f32 %v784_v48, %v784_v48  ;;  %v286_v47 = vld [vmem:[#allocation2 + $0x728] sm:$0xff] }
 0x1b3   :  { %v542_v48 = vld [vmem:[#allocation5 + $0x728] sm:$0xff] }
 0x1b4   :  { %v1283_v5 = vadd.f32 %v1282_v0, %v1027_v58  ;;  %v786_v58 = vsub.f32 %v274_v51, %v530_v52  ;;  %v1041_v0 = vmul.f32 %v785_v53, %v785_v53  ;;  %v287_v52 = vld [vmem:[#allocation2 + $0x730] sm:$0xff] }
 0x1b5   :  { %v543_v53 = vld [vmem:[#allocation5 + $0x730] sm:$0xff] }
 0x1b6   :  { %v1284_v10 = vadd.f32 %v1283_v5, %v1028_v63  ;;  %v787_v63 = vsub.f32 %v275_v56, %v531_v57  ;;  %v1042_v5 = vmul.f32 %v786_v58, %v786_v58  ;;  %v288_v57 = vld [vmem:[#allocation2 + $0x738] sm:$0xff] }
 0x1b7   :  { %v544_v58 = vld [vmem:[#allocation5 + $0x738] sm:$0xff] }
 0x1b8   :  { %v1285_v15 = vadd.f32 %v1284_v10, %v1029_v4  ;;  %v788_v4 = vsub.f32 %v276_v61, %v532_v62  ;;  %v1043_v10 = vmul.f32 %v787_v63, %v787_v63  ;;  %v289_v62 = vld [vmem:[#allocation2 + $0x740] sm:$0xff] }
 0x1b9   :  { %v545_v63 = vld [vmem:[#allocation5 + $0x740] sm:$0xff] }
 0x1ba   :  { %v1286_v20 = vadd.f32 %v1285_v15, %v1030_v9  ;;  %v789_v9 = vsub.f32 %v277_v2, %v533_v3  ;;  %v1044_v15 = vmul.f32 %v788_v4, %v788_v4  ;;  %v290_v3 = vld [vmem:[#allocation2 + $0x748] sm:$0xff] }
 0x1bb   :  { %v546_v4 = vld [vmem:[#allocation5 + $0x748] sm:$0xff] }
 0x1bc   :  { %v1287_v25 = vadd.f32 %v1286_v20, %v1031_v14  ;;  %v790_v14 = vsub.f32 %v278_v7, %v534_v8  ;;  %v1045_v20 = vmul.f32 %v789_v9, %v789_v9  ;;  %v291_v8 = vld [vmem:[#allocation2 + $0x750] sm:$0xff] }
 0x1bd   :  { %v547_v9 = vld [vmem:[#allocation5 + $0x750] sm:$0xff] }
 0x1be   :  { %v1288_v30 = vadd.f32 %v1287_v25, %v1032_v19  ;;  %v791_v19 = vsub.f32 %v279_v12, %v535_v13  ;;  %v1046_v25 = vmul.f32 %v790_v14, %v790_v14  ;;  %v292_v13 = vld [vmem:[#allocation2 + $0x758] sm:$0xff] }
 0x1bf   :  { %v548_v14 = vld [vmem:[#allocation5 + $0x758] sm:$0xff] }
 0x1c0   :  { %v1289_v35 = vadd.f32 %v1288_v30, %v1033_v24  ;;  %v792_v24 = vsub.f32 %v280_v17, %v536_v18  ;;  %v1047_v30 = vmul.f32 %v791_v19, %v791_v19  ;;  %v293_v18 = vld [vmem:[#allocation2 + $0x760] sm:$0xff] }
 0x1c1   :  { %v549_v19 = vld [vmem:[#allocation5 + $0x760] sm:$0xff] }
 0x1c2   :  { %v1290_v40 = vadd.f32 %v1289_v35, %v1034_v29  ;;  %v793_v29 = vsub.f32 %v281_v22, %v537_v23  ;;  %v1048_v35 = vmul.f32 %v792_v24, %v792_v24  ;;  %v294_v23 = vld [vmem:[#allocation2 + $0x768] sm:$0xff] }
 0x1c3   :  { %v550_v24 = vld [vmem:[#allocation5 + $0x768] sm:$0xff] }
 0x1c4   :  { %v1291_v45 = vadd.f32 %v1290_v40, %v1035_v34  ;;  %v794_v34 = vsub.f32 %v282_v27, %v538_v28  ;;  %v1049_v40 = vmul.f32 %v793_v29, %v793_v29  ;;  %v295_v28 = vld [vmem:[#allocation2 + $0x770] sm:$0xff] }
 0x1c5   :  { %v551_v29 = vld [vmem:[#allocation5 + $0x770] sm:$0xff] }
 0x1c6   :  { %v1292_v50 = vadd.f32 %v1291_v45, %v1036_v39  ;;  %v795_v39 = vsub.f32 %v283_v32, %v539_v33  ;;  %v1050_v45 = vmul.f32 %v794_v34, %v794_v34  ;;  %v296_v33 = vld [vmem:[#allocation2 + $0x778] sm:$0xff] }
 0x1c7   :  { %v552_v34 = vld [vmem:[#allocation5 + $0x778] sm:$0xff] }
 0x1c8   :  { %v1293_v55 = vadd.f32 %v1292_v50, %v1037_v44  ;;  %v796_v44 = vsub.f32 %v284_v37, %v540_v38  ;;  %v1051_v50 = vmul.f32 %v795_v39, %v795_v39  ;;  %v297_v38 = vld [vmem:[#allocation2 + $0x780] sm:$0xff] }
 0x1c9   :  { %v553_v39 = vld [vmem:[#allocation5 + $0x780] sm:$0xff] }
 0x1ca   :  { %v1294_v60 = vadd.f32 %v1293_v55, %v1038_v49  ;;  %v797_v49 = vsub.f32 %v285_v42, %v541_v43  ;;  %v1052_v55 = vmul.f32 %v796_v44, %v796_v44  ;;  %v298_v43 = vld [vmem:[#allocation2 + $0x788] sm:$0xff] }
 0x1cb   :  { %v554_v44 = vld [vmem:[#allocation5 + $0x788] sm:$0xff] }
 0x1cc   :  { %v1295_v1 = vadd.f32 %v1294_v60, %v1039_v54  ;;  %v798_v54 = vsub.f32 %v286_v47, %v542_v48  ;;  %v1053_v60 = vmul.f32 %v797_v49, %v797_v49  ;;  %v299_v48 = vld [vmem:[#allocation2 + $0x790] sm:$0xff] }
 0x1cd   :  { %v555_v49 = vld [vmem:[#allocation5 + $0x790] sm:$0xff] }
 0x1ce   :  { %v1296_v6 = vadd.f32 %v1295_v1, %v1040_v59  ;;  %v799_v59 = vsub.f32 %v287_v52, %v543_v53  ;;  %v1054_v1 = vmul.f32 %v798_v54, %v798_v54  ;;  %v300_v53 = vld [vmem:[#allocation2 + $0x798] sm:$0xff] }
 0x1cf   :  { %v556_v54 = vld [vmem:[#allocation5 + $0x798] sm:$0xff] }
 0x1d0   :  { %v1297_v11 = vadd.f32 %v1296_v6, %v1041_v0  ;;  %v800_v0 = vsub.f32 %v288_v57, %v544_v58  ;;  %v1055_v6 = vmul.f32 %v799_v59, %v799_v59  ;;  %v301_v58 = vld [vmem:[#allocation2 + $0x7a0] sm:$0xff] }
 0x1d1   :  { %v557_v59 = vld [vmem:[#allocation5 + $0x7a0] sm:$0xff] }
 0x1d2   :  { %v1298_v16 = vadd.f32 %v1297_v11, %v1042_v5  ;;  %v801_v5 = vsub.f32 %v289_v62, %v545_v63  ;;  %v1056_v11 = vmul.f32 %v800_v0, %v800_v0  ;;  %v302_v63 = vld [vmem:[#allocation2 + $0x7a8] sm:$0xff] }
 0x1d3   :  { %v558_v0 = vld [vmem:[#allocation5 + $0x7a8] sm:$0xff] }
 0x1d4   :  { %v1299_v21 = vadd.f32 %v1298_v16, %v1043_v10  ;;  %v802_v10 = vsub.f32 %v290_v3, %v546_v4  ;;  %v1057_v16 = vmul.f32 %v801_v5, %v801_v5  ;;  %v303_v4 = vld [vmem:[#allocation2 + $0x7b0] sm:$0xff] }
 0x1d5   :  { %v559_v5 = vld [vmem:[#allocation5 + $0x7b0] sm:$0xff] }
 0x1d6   :  { %v1300_v26 = vadd.f32 %v1299_v21, %v1044_v15  ;;  %v803_v15 = vsub.f32 %v291_v8, %v547_v9  ;;  %v1058_v21 = vmul.f32 %v802_v10, %v802_v10  ;;  %v304_v9 = vld [vmem:[#allocation2 + $0x7b8] sm:$0xff] }
 0x1d7   :  { %v560_v10 = vld [vmem:[#allocation5 + $0x7b8] sm:$0xff] }
 0x1d8   :  { %v1301_v31 = vadd.f32 %v1300_v26, %v1045_v20  ;;  %v804_v20 = vsub.f32 %v292_v13, %v548_v14  ;;  %v1059_v26 = vmul.f32 %v803_v15, %v803_v15  ;;  %v305_v14 = vld [vmem:[#allocation2 + $0x7c0] sm:$0xff] }
 0x1d9   :  { %v561_v15 = vld [vmem:[#allocation5 + $0x7c0] sm:$0xff] }
 0x1da   :  { %v1302_v36 = vadd.f32 %v1301_v31, %v1046_v25  ;;  %v805_v25 = vsub.f32 %v293_v18, %v549_v19  ;;  %v1060_v31 = vmul.f32 %v804_v20, %v804_v20  ;;  %v306_v19 = vld [vmem:[#allocation2 + $0x7c8] sm:$0xff] }
 0x1db   :  { %v562_v20 = vld [vmem:[#allocation5 + $0x7c8] sm:$0xff] }
 0x1dc   :  { %v1303_v41 = vadd.f32 %v1302_v36, %v1047_v30  ;;  %v806_v30 = vsub.f32 %v294_v23, %v550_v24  ;;  %v1061_v36 = vmul.f32 %v805_v25, %v805_v25  ;;  %v307_v24 = vld [vmem:[#allocation2 + $0x7d0] sm:$0xff] }
 0x1dd   :  { %v563_v25 = vld [vmem:[#allocation5 + $0x7d0] sm:$0xff] }
 0x1de   :  { %v1304_v46 = vadd.f32 %v1303_v41, %v1048_v35  ;;  %v807_v35 = vsub.f32 %v295_v28, %v551_v29  ;;  %v1062_v41 = vmul.f32 %v806_v30, %v806_v30  ;;  %v308_v29 = vld [vmem:[#allocation2 + $0x7d8] sm:$0xff] }
 0x1df   :  { %v564_v30 = vld [vmem:[#allocation5 + $0x7d8] sm:$0xff] }
 0x1e0   :  { %v1305_v51 = vadd.f32 %v1304_v46, %v1049_v40  ;;  %v808_v40 = vsub.f32 %v296_v33, %v552_v34  ;;  %v1063_v46 = vmul.f32 %v807_v35, %v807_v35  ;;  %v309_v34 = vld [vmem:[#allocation2 + $0x7e0] sm:$0xff] }
 0x1e1   :  { %v565_v35 = vld [vmem:[#allocation5 + $0x7e0] sm:$0xff] }
 0x1e2   :  { %v1306_v56 = vadd.f32 %v1305_v51, %v1050_v45  ;;  %v809_v45 = vsub.f32 %v297_v38, %v553_v39  ;;  %v1064_v51 = vmul.f32 %v808_v40, %v808_v40  ;;  %v310_v39 = vld [vmem:[#allocation2 + $0x7e8] sm:$0xff] }
 0x1e3   :  { %v566_v40 = vld [vmem:[#allocation5 + $0x7e8] sm:$0xff] }
 0x1e4   :  { %v1307_v61 = vadd.f32 %v1306_v56, %v1051_v50  ;;  %v810_v50 = vsub.f32 %v298_v43, %v554_v44  ;;  %v1065_v56 = vmul.f32 %v809_v45, %v809_v45  ;;  %v311_v44 = vld [vmem:[#allocation2 + $0x7f0] sm:$0xff] }
 0x1e5   :  { %v567_v45 = vld [vmem:[#allocation5 + $0x7f0] sm:$0xff] }
 0x1e6   :  { %v1308_v2 = vadd.f32 %v1307_v61, %v1052_v55  ;;  %v811_v55 = vsub.f32 %v299_v48, %v555_v49  ;;  %v1066_v61 = vmul.f32 %v810_v50, %v810_v50  ;;  %v312_v49 = vld [vmem:[#allocation2 + $0x7f8] sm:$0xff] }
 0x1e7   :  { %v568_v50 = vld [vmem:[#allocation5 + $0x7f8] sm:$0xff] }
 0x1e8   :  { %v1309_v7 = vadd.f32 %v1308_v2, %v1053_v60  ;;  %v812_v60 = vsub.f32 %v300_v53, %v556_v54  ;;  %v1067_v2 = vmul.f32 %v811_v55, %v811_v55  ;;  %v824_v54 = vsub.f32 %v312_v49, %v568_v50 }
 0x1ea   :  { %v1310_v12 = vadd.f32 %v1309_v7, %v1054_v1  ;;  %v813_v1 = vsub.f32 %v301_v58, %v557_v59  ;;  %v1068_v7 = vmul.f32 %v812_v60, %v812_v60  ;;  %v1080_v59 = vmul.f32 %v824_v54, %v824_v54 }
 0x1ec   :  { %v1311_v17 = vadd.f32 %v1310_v12, %v1055_v6  ;;  %v814_v6 = vsub.f32 %v302_v63, %v558_v0  ;;  %v1069_v12 = vmul.f32 %v813_v1, %v813_v1 }
 0x1ee   :  { %v1312_v22 = vadd.f32 %v1311_v17, %v1056_v11  ;;  %v815_v11 = vsub.f32 %v303_v4, %v559_v5  ;;  %v1070_v17 = vmul.f32 %v814_v6, %v814_v6 }
 0x1f0   :  { %v1313_v27 = vadd.f32 %v1312_v22, %v1057_v16  ;;  %v816_v16 = vsub.f32 %v304_v9, %v560_v10  ;;  %v1071_v22 = vmul.f32 %v815_v11, %v815_v11 }
 0x1f2   :  { %v1314_v32 = vadd.f32 %v1313_v27, %v1058_v21  ;;  %v817_v21 = vsub.f32 %v305_v14, %v561_v15  ;;  %v1072_v27 = vmul.f32 %v816_v16, %v816_v16 }
 0x1f4   :  { %v1315_v37 = vadd.f32 %v1314_v32, %v1059_v26  ;;  %v818_v26 = vsub.f32 %v306_v19, %v562_v20  ;;  %v1073_v32 = vmul.f32 %v817_v21, %v817_v21 }
 0x1f6   :  { %v1316_v42 = vadd.f32 %v1315_v37, %v1060_v31  ;;  %v819_v31 = vsub.f32 %v307_v24, %v563_v25  ;;  %v1074_v37 = vmul.f32 %v818_v26, %v818_v26 }
 0x1f8   :  { %v1317_v47 = vadd.f32 %v1316_v42, %v1061_v36  ;;  %v820_v36 = vsub.f32 %v308_v29, %v564_v30  ;;  %v1075_v42 = vmul.f32 %v819_v31, %v819_v31 }
 0x1fa   :  { %v1318_v52 = vadd.f32 %v1317_v47, %v1062_v41  ;;  %v821_v41 = vsub.f32 %v309_v34, %v565_v35  ;;  %v1076_v47 = vmul.f32 %v820_v36, %v820_v36 }
 0x1fc   :  { %v1319_v57 = vadd.f32 %v1318_v52, %v1063_v46  ;;  %v822_v46 = vsub.f32 %v310_v39, %v566_v40  ;;  %v1077_v52 = vmul.f32 %v821_v41, %v821_v41 }
 0x1fe   :  { %v1320_v62 = vadd.f32 %v1319_v57, %v1064_v51  ;;  %v823_v51 = vsub.f32 %v311_v44, %v567_v45  ;;  %v1078_v55 = vmul.f32 %v822_v46, %v822_v46 }
 0x200   :  { %v1321_v3 = vadd.f32 %v1320_v62, %v1065_v56  ;;  %v1079_v57 = vmul.f32 %v823_v51, %v823_v51 }
 0x202   :  { %v1322_v8 = vadd.f32 %v1321_v3, %v1066_v61 }
 0x204   :  { %v1323_v13 = vadd.f32 %v1322_v8, %v1067_v2 }
 0x206   :  { %v1324_v18 = vadd.f32 %v1323_v13, %v1068_v7 }
 0x208   :  { %v1325_v23 = vadd.f32 %v1324_v18, %v1069_v12 }
 0x20a   :  { %v1326_v28 = vadd.f32 %v1325_v23, %v1070_v17 }
 0x20c   :  { %v1327_v33 = vadd.f32 %v1326_v28, %v1071_v22 }
 0x20e   :  { %v1328_v38 = vadd.f32 %v1327_v33, %v1072_v27 }
 0x210   :  { %v1329_v43 = vadd.f32 %v1328_v38, %v1073_v32 }
 0x212   :  { %v1330_v48 = vadd.f32 %v1329_v43, %v1074_v37 }
 0x214   :  { %v1331_v53 = vadd.f32 %v1330_v48, %v1075_v42 }
 0x216   :  { %v1332_v56 = vadd.f32 %v1331_v53, %v1076_v47 }
 0x218   :  { %v1333_v58 = vadd.f32 %v1332_v56, %v1077_v52 }
 0x21a   :  { %v1334_v60 = vadd.f32 %v1333_v58, %v1078_v55 }
 0x21c   :  { %v1335_v61 = vadd.f32 %v1334_v60, %v1079_v57 }
 0x21e   :  { %v1336_v62 = vadd.f32 %v1335_v61, %v1080_v59 }
 0x220   :  { %1338 = vst [vmem:[#allocation7] sm:$0xff] %v1336_v62 }
 0x221   :  { %1412 = shalt.err (!%p1409_p0)
}
 0x222   :  { %1348 = dma.vmem_to_hbm [thread:$0]  %s1346_s1, 128, %s1458_s2, [#allocation4]  }
 0x223   :  { %1425 = dma.done.wait [#allocation4], 128  }
 0x224   :  { %1426 = vsyncadd [#allocation4], 4294967168 }
 0x225   :  { %1352 = vsyncpa [#allocation3], 1 }
 0x226   :  { %1353 = vsyncpa [#allocation6], 1 }
 0x227   :  { %1354 = vsyncpa [#allocation4], 1 }

</bundles_post_ra>
